<compile_context>
chip_gen: v7x
topology: tpu7x:2x2x1
jax: 0.10.0
libtpu: 0.0.40
codegen_flags: <defaults>
</compile_context>

<pallas_src>
import functools
import math

import jax
import jax.numpy as jnp
import numpy as np
from jax.experimental import pallas as pl
from jax.experimental.pallas import tpu as pltpu


# --------------------------------------------------------------------------- #
# Sinusoidal positional encoding (tiny k^2 x C constant, built in the wrapper) #
# --------------------------------------------------------------------------- #
def _positional_encoding(seq_length, d_model):
    pos = jnp.arange(seq_length, dtype=jnp.float32)[:, None]
    div_term = jnp.exp(
        jnp.arange(0, d_model, 2, dtype=jnp.float32) * (-math.log(10000.0) / d_model)
    )
    pe = jnp.zeros((seq_length, d_model + d_model % 2), jnp.float32)
    pe = pe.at[:, 0::2].set(jnp.sin(pos * div_term))
    pe = pe.at[:, 1::2].set(jnp.cos(pos * div_term))
    return pe[:, :d_model]


# --------------------------------------------------------------------------- #
# Pallas kernel: one haloed, channel-major row-tile of one batch element.      #
# --------------------------------------------------------------------------- #
def _attn_conv_kernel(
    x_ref, w1_ref, b1_ref, w2_ref, b2_ref, posk_ref, row_ref, col_ref, o_ref,
    *, H, W, TH, ksize, A, Cout, scale, ln_eps,
):
    k2 = ksize * ksize
    m = (ksize - 1) // 2
    TILE = TH * W
    base = m * W + m          # offset of query pixel 0 inside the haloed tile
    t = pl.program_id(1)      # which row-tile of the image

    x = x_ref[0, 0]           # (Cin, EXT) channel-major; EXT = TILE + 2mW + 2m

    # ---- LayerNorm over channels (sublane axis); affine folded into w1/b1 ----
    mu = jnp.mean(x, axis=0, keepdims=True)
    xc = x - mu
    var = jnp.mean(xc * xc, axis=0, keepdims=True)
    xn = xc * jax.lax.rsqrt(var + ln_eps)                     # (Cin, EXT)

    # ---- fused Q/K/V projections, channel-major ----
    h = jnp.dot(w1_ref[...], xn, preferred_element_type=jnp.float32) + b1_ref[...]
    h = jnp.maximum(h, 0.0)                                   # (6A, EXT)
    qkv = jnp.dot(w2_ref[...], h, preferred_element_type=jnp.float32) + b2_ref[...]

    q = qkv[0:A, base:base + TILE] * scale                    # (A, TILE), scale folded
    k_full = qkv[A:2 * A, :]                                  # (A, EXT)
    v_full = qkv[2 * A:2 * A + Cout, :]                       # (Cout, EXT)

    # ---- positional logits: one MXU matmul (k2,A)@(A,TILE) ----
    qpos = jnp.dot(posk_ref[...], q, preferred_element_type=jnp.float32)  # (k2, TILE)

    # ---- boundary masks from precomputed (1,TILE) row/col indices (no div/mod)
    hg = t * TH + row_ref[...]                                # (1, TILE) int32
    wg = col_ref[...]                                         # (1, TILE) int32

    # ---- per-tap q.k logits (sublane reduce over A channels), lane-dense ----
    raw_rows = []
    mask_rows = []
    for di in range(-m, m + 1):
        for dj in range(-m, m + 1):
            s = di * W + dj
            ksl = k_full[:, base + s: base + s + TILE]        # (A, TILE) static slice
            raw = jnp.sum(q * ksl, axis=0, keepdims=True)     # (1, TILE)
            ok = ((hg + di >= 0) & (hg + di < H)
                  & (wg + dj >= 0) & (wg + dj < W)).astype(jnp.float32)
            raw_rows.append(raw * ok)                         # invalid tap -> logit qpos
            mask_rows.append(ok)
    logits = jnp.concatenate(raw_rows, axis=0) + qpos         # (k2, TILE)
    maskf = jnp.concatenate(mask_rows, axis=0)                 # (k2, TILE) 0/1

    # ---- vectorized softmax over the k2 sublane-packed taps ----
    mmax = jnp.max(logits, axis=0, keepdims=True)
    e = jnp.exp(logits - mmax)
    denom = jnp.sum(e, axis=0, keepdims=True)
    inv = pl.reciprocal(denom, approx=True)
    inv = inv * (2.0 - denom * inv)        # one Newton step -> full f32 accuracy
    attn = e * inv * maskf                 # zero weight on out-of-image taps

    # ---- weighted sum of shifted V, accumulated directly as (Cout, TILE) ----
    out = jnp.zeros((Cout, TILE), jnp.float32)
    p = 0
    for di in range(-m, m + 1):
        for dj in range(-m, m + 1):
            s = di * W + dj
            vsl = v_full[:, base + s: base + s + TILE]         # (Cout, TILE)
            out = out + vsl * attn[p:p + 1, :]
            p += 1

    o_ref[0] = out.astype(o_ref.dtype)     # already lane-dense (Cout, TILE)


# --------------------------------------------------------------------------- #
# Wrapper                                                                      #
# --------------------------------------------------------------------------- #
def attention_conv2d(x_nchw, params, *, kernel_size=3, stride=1, tile_rows=None):
    """x_nchw: (N, Cin, H, W) float32. Returns (N, Cout, ceil(H/s), ceil(W/s))."""
    N, Cin, H, W = x_nchw.shape
    A = params["wq2"].shape[1]
    Cout = params["wv2"].shape[1]
    HW = H * W
    k2 = kernel_size * kernel_size
    m = (kernel_size - 1) // 2

    # Tile choice: <=4096 pixels per tile (safe on v7x's 64 MiB VMEM, channel-major
    # intermediates are only a few MiB), prefer >=4 grid steps for TC balance.
    if tile_rows is None:
        cands = [th for th in range(1, H + 1)
                 if H % th == 0 and (th * W) % 128 == 0]
        pool = [th for th in cands if th * W <= 4096] or cands
        balanced = [th for th in pool if N * (H // th) >= 4]
        if balanced:
            tile_rows = max(balanced)
        elif pool:
            tile_rows = max(pool)
        else:
            tile_rows = H
    TH = tile_rows
    assert H % TH == 0, "tile_rows must divide H"
    TILE = TH * W
    assert TILE % 128 == 0 or TH == H, "tile_rows * W must be a multiple of 128"
    n_tiles = H // TH

    # Haloed, overlapping row windows, channel-major (no NCHW->NHWC transpose).
    x = x_nchw.astype(jnp.float32)
    x_pad = jnp.pad(x, ((0, 0), (0, 0), (m, m), (0, 0)))            # pad H
    x_flat = x_pad.reshape(N, Cin, (H + 2 * m) * W)
    x_flat = jnp.pad(x_flat, ((0, 0), (0, 0), (m, m)))              # flat ends
    EXT = TILE + 2 * m * W + 2 * m
    x_tiles = jnp.stack(
        [x_flat[:, :, tt * TILE: tt * TILE + EXT] for tt in range(n_tiles)], axis=1
    )  # (N, n_tiles, Cin, EXT)
    # TODO(synk): on v5e, replace this staged-halo materialization with a manual
    # double-buffered make_async_copy window over x_flat kept in HBM (pl.ANY).

    # positional branch (tiny k^2 x C): to_pos -> ReLU -> to_posk
    pe = _positional_encoding(k2, Cin)
    pos_emb = jax.nn.relu(pe @ params["wpos"] + params["bpos"])     # (k2, A)
    pos_k = pos_emb @ params["wposk"] + params["bposk"]             # (k2, A)

    # fused projection weights with LayerNorm affine folded in
    gamma, beta = params["gamma"], params["beta"]
    w1f = jnp.concatenate([params["wq1"], params["wk1"], params["wv1"]], axis=1)
    b1f = jnp.concatenate([params["bq1"], params["bk1"], params["bv1"]], axis=1)
    w1f = w1f * jnp.transpose(gamma)                                # diag(gamma) @ W1
    b1f = beta @ jnp.concatenate(
        [params["wq1"], params["wk1"], params["wv1"]], axis=1) + b1f

    w2f = jnp.zeros((6 * A, 2 * A + Cout), jnp.float32)
    w2f = w2f.at[0:2 * A, 0:A].set(params["wq2"])
    w2f = w2f.at[2 * A:4 * A, A:2 * A].set(params["wk2"])
    w2f = w2f.at[4 * A:6 * A, 2 * A:2 * A + Cout].set(params["wv2"])
    b2f = jnp.concatenate([params["bq2"], params["bk2"], params["bv2"]], axis=1)

    # channel-major weight layouts for the kernel
    w1cm = jnp.transpose(w1f)                  # (6A, Cin)
    b1cm = jnp.transpose(b1f)                  # (6A, 1)
    w2cm = jnp.transpose(w2f)                  # (2A+Cout, 6A)
    b2cm = jnp.transpose(b2f)                  # (2A+Cout, 1)

    # tile-invariant row/col indices of each query pixel (avoid in-kernel div/mod)
    rowidx = jnp.repeat(jnp.arange(TH, dtype=jnp.int32), W).reshape(1, TILE)
    colidx = jnp.tile(jnp.arange(W, dtype=jnp.int32), TH).reshape(1, TILE)

    scale = float(A) ** -0.5
    kernel = functools.partial(
        _attn_conv_kernel, H=H, W=W, TH=TH, ksize=kernel_size,
        A=A, Cout=Cout, scale=scale, ln_eps=1e-5,
    )

    ws = [w1cm, b1cm, w2cm, b2cm, pos_k, rowidx, colidx]

    out_cf = pl.pallas_call(
        kernel,
        out_shape=jax.ShapeDtypeStruct((N, Cout, HW), jnp.float32),
        grid_spec=pltpu.PrefetchScalarGridSpec(
            num_scalar_prefetch=0,
            grid=(N, n_tiles),
            in_specs=[pl.BlockSpec((1, 1, Cin, EXT), lambda b, tt: (b, tt, 0, 0))]
            + [pl.BlockSpec(w.shape, lambda b, tt: (0, 0)) for w in ws],
            out_specs=pl.BlockSpec((1, Cout, TILE), lambda b, tt: (b, 0, tt)),
        ),
        compiler_params=pltpu.CompilerParams(
            dimension_semantics=("parallel", "parallel"),
            vmem_limit_bytes=48 * 1024 * 1024,
        ),
    )(x_tiles, *ws)

    out = out_cf.reshape(N, Cout, H, W)   # lane-dense kernel output is already NCHW
    # TODO(synk): for stride > 1, restrict the query rows inside the kernel
    # instead of computing all H*W outputs and discarding them here.
    return out[:, :, ::stride, ::stride]


# --------------------------------------------------------------------------- #
# Pure-JAX reference (mirrors the PyTorch forward) for validation.             #
# --------------------------------------------------------------------------- #
def reference_forward(x, params, kernel_size=3, stride=1):
    N, Cin, H, W = x.shape
    A = params["wq2"].shape[1]
    k2 = kernel_size * kernel_size
    m = (kernel_size - 1) // 2

    pe = _positional_encoding(k2, Cin)
    pos_emb = jax.nn.relu(pe @ params["wpos"] + params["bpos"])
    pos_k = pos_emb @ params["wposk"] + params["bposk"]  # (k2, A)

    xh = jnp.transpose(x, (0, 2, 3, 1))
    mu = xh.mean(-1, keepdims=True)
    var = ((xh - mu) ** 2).mean(-1, keepdims=True)
    xn = (xh - mu) / jnp.sqrt(var + 1e-5) * params["gamma"][0] + params["beta"][0]

    def mlp(z, w1, b1, w2, b2):
        return jax.nn.relu(z @ w1 + b1) @ w2 + b2

    Q = mlp(xn, params["wq1"], params["bq1"], params["wq2"], params["bq2"])
    K = mlp(xn, params["wk1"], params["bk1"], params["wk2"], params["bk2"])
    V = mlp(xn, params["wv1"], params["bv1"], params["wv2"], params["bv2"])

    def expand(T):  # (N,H,W,C) -> (N,C,H,W,k2), zero-padded shifted copies
        Tc = jnp.transpose(T, (0, 3, 1, 2))
        Tp = jnp.pad(Tc, ((0, 0), (0, 0), (m, m), (m, m)))
        outs = []
        for di in range(-m, m + 1):
            for dj in range(-m, m + 1):
                outs.append(Tp[:, :, di + m: di + m + H, dj + m: dj + m + W])
        return jnp.stack(outs, axis=-1)

    Kx = expand(K) + jnp.transpose(pos_k)[None, :, None, None, :]
    Vx = expand(V)
    att = jnp.einsum("bhwa,bahwp->bphw", Q, Kx) * (float(A) ** -0.5)
    att = jax.nn.softmax(att, axis=1)
    out = jnp.einsum("bchwn,bnhw->bchw", Vx, att)
    return out[:, :, ::stride, ::stride]


# --------------------------------------------------------------------------- #
if __name__ == "__main__":
    N, Cin, H, W = 2, 8, 16, 16
    Cout = 8
    ksize = 3
    A = Cin  # attention_size defaults to input_size
    stride = 1

    key = jax.random.PRNGKey(0)
    keys = jax.random.split(key, 12)

    def lin(k, fan_in, fan_out):
        kw, kb = jax.random.split(k)
        bound = 1.0 / math.sqrt(fan_in)
        w = jax.random.uniform(kw, (fan_in, fan_out), jnp.float32, -bound, bound)
        b = jax.random.uniform(kb, (1, fan_out), jnp.float32, -bound, bound)
        return w, b

    wq1, bq1 = lin(keys[0], Cin, 2 * A)
    wq2, bq2 = lin(keys[1], 2 * A, A)
    wk1, bk1 = lin(keys[2], Cin, 2 * A)
    wk2, bk2 = lin(keys[3], 2 * A, A)
    wv1, bv1 = lin(keys[4], Cin, 2 * A)
    wv2, bv2 = lin(keys[5], 2 * A, Cout)
    wpos, bpos = lin(keys[6], Cin, A)
    wposk, bposk = lin(keys[7], A, A)

    # non-trivial LayerNorm affine to exercise the gamma/beta weight fold
    gamma = 1.0 + 0.1 * jax.random.normal(keys[9], (1, Cin), jnp.float32)
    beta = 0.1 * jax.random.normal(keys[10], (1, Cin), jnp.float32)

    params = dict(
        gamma=gamma, beta=beta,
        wq1=wq1, bq1=bq1, wq2=wq2, bq2=bq2,
        wk1=wk1, bk1=bk1, wk2=wk2, bk2=bk2,
        wv1=wv1, bv1=bv1, wv2=wv2, bv2=bv2,
        wpos=wpos, bpos=bpos, wposk=wposk, bposk=bposk,
    )

    x = jax.random.normal(keys[8], (N, Cin, H, W), jnp.float32)

    # tile_rows=8 -> 2 haloed row-tiles per image (exercises the H-tiled path).
    out = attention_conv2d(x, params, kernel_size=ksize, stride=stride, tile_rows=8)
    out = jax.block_until_ready(out)
    assert out.shape == (N, Cout, H, W), out.shape

    ref = jax.block_until_ready(
        reference_forward(x, params, kernel_size=ksize, stride=stride)
    )
    np.testing.assert_allclose(np.asarray(out), np.asarray(ref), rtol=1e-4, atol=1e-4)

    print("KERNEL_OK")
</pallas_src>

<mosaic_0001>
module attributes {stable_mosaic.version = 11 : i64} {
  func.func @_attn_conv_kernel(%arg0: i32, %arg1: i32, %arg2: memref<1x1x8x162xf32, #tpu.memory_space<vmem>>, %arg3: memref<48x8xf32, #tpu.memory_space<vmem>>, %arg4: memref<48x1xf32, #tpu.memory_space<vmem>>, %arg5: memref<24x48xf32, #tpu.memory_space<vmem>>, %arg6: memref<24x1xf32, #tpu.memory_space<vmem>>, %arg7: memref<9x8xf32, #tpu.memory_space<vmem>>, %arg8: memref<1x128xi32, #tpu.memory_space<vmem>>, %arg9: memref<1x128xi32, #tpu.memory_space<vmem>>, %arg10: memref<1x8x128xf32, #tpu.memory_space<vmem>>) attributes {dimension_semantics = [#tpu.dimension_semantics<parallel>, #tpu.dimension_semantics<parallel>], iteration_bounds = array<i64: 2, 2>, scalar_prefetch = 0 : i64, scratch_operands = 0 : i64, tpu.core_type = #tpu.core_type<tc>, window_params = [{transform_indices = @transform_0, window_bounds = array<i64: 1, 1, 8, 162>}, {pipeline_mode = #tpu.pipeline_mode<synchronous>, transform_indices = @transform_1, window_bounds = array<i64: 48, 8>}, {pipeline_mode = #tpu.pipeline_mode<synchronous>, transform_indices = @transform_2, window_bounds = array<i64: 48, 1>}, {pipeline_mode = #tpu.pipeline_mode<synchronous>, transform_indices = @transform_3, window_bounds = array<i64: 24, 48>}, {pipeline_mode = #tpu.pipeline_mode<synchronous>, transform_indices = @transform_4, window_bounds = array<i64: 24, 1>}, {pipeline_mode = #tpu.pipeline_mode<synchronous>, transform_indices = @transform_5, window_bounds = array<i64: 9, 8>}, {pipeline_mode = #tpu.pipeline_mode<synchronous>, transform_indices = @transform_6, window_bounds = array<i64: 1, 128>}, {pipeline_mode = #tpu.pipeline_mode<synchronous>, transform_indices = @transform_7, window_bounds = array<i64: 1, 128>}, {transform_indices = @transform_8, window_bounds = array<i64: 1, 8, 128>}]} {
    %c0 = arith.constant 0 : index
    %c0_0 = arith.constant 0 : index
    %c0_1 = arith.constant 0 : index
    %c0_2 = arith.constant 0 : index
    %0 = vector.load %arg2[%c0, %c0_0, %c0_1, %c0_2] : memref<1x1x8x162xf32, #tpu.memory_space<vmem>>, vector<1x1x8x162xf32>
    %1 = vector.shape_cast %0 : vector<1x1x8x162xf32> to vector<8x162xf32>
    %cst = arith.constant dense<0.000000e+00> : vector<162xf32>
    %2 = vector.multi_reduction <add>, %1, %cst [0] : vector<8x162xf32> to vector<162xf32>
    %3 = vector.shape_cast %2 : vector<162xf32> to vector<1x162xf32>
    %cst_3 = arith.constant 8.000000e+00 : f32
    %4 = vector.broadcast %cst_3 : f32 to vector<1x162xf32>
    %5 = arith.divf %3, %4 : vector<1x162xf32>
    %6 = vector.broadcast %5 : vector<1x162xf32> to vector<8x162xf32>
    %7 = arith.subf %1, %6 : vector<8x162xf32>
    %8 = arith.mulf %7, %7 : vector<8x162xf32>
    %cst_4 = arith.constant dense<0.000000e+00> : vector<162xf32>
    %9 = vector.multi_reduction <add>, %8, %cst_4 [0] : vector<8x162xf32> to vector<162xf32>
    %10 = vector.shape_cast %9 : vector<162xf32> to vector<1x162xf32>
    %cst_5 = arith.constant 8.000000e+00 : f32
    %11 = vector.broadcast %cst_5 : f32 to vector<1x162xf32>
    %12 = arith.divf %10, %11 : vector<1x162xf32>
    %cst_6 = arith.constant 9.99999974E-6 : f32
    %13 = vector.broadcast %cst_6 : f32 to vector<1x162xf32>
    %14 = arith.addf %12, %13 : vector<1x162xf32>
    %15 = math.rsqrt %14 : vector<1x162xf32>
    %16 = vector.broadcast %15 : vector<1x162xf32> to vector<8x162xf32>
    %17 = arith.mulf %7, %16 : vector<8x162xf32>
    %c0_7 = arith.constant 0 : index
    %c0_8 = arith.constant 0 : index
    %18 = vector.load %arg3[%c0_7, %c0_8] : memref<48x8xf32, #tpu.memory_space<vmem>>, vector<48x8xf32>
    %cst_9 = arith.constant dense<0.000000e+00> : vector<48x162xf32>
    %19 = tpu.matmul %18, %17, %cst_9 {dimension_numbers = #tpu.dot_dimension_numbers<[1], [0], [0], [1], [0, 0, 1, 1], [], []>} : vector<48x8xf32>, vector<8x162xf32>, vector<48x162xf32> -> vector<48x162xf32>
    %c0_10 = arith.constant 0 : index
    %c0_11 = arith.constant 0 : index
    %20 = vector.load %arg4[%c0_10, %c0_11] : memref<48x1xf32, #tpu.memory_space<vmem>>, vector<48x1xf32>
    %21 = vector.broadcast %20 : vector<48x1xf32> to vector<48x162xf32>
    %22 = arith.addf %19, %21 : vector<48x162xf32>
    %cst_12 = arith.constant 0.000000e+00 : f32
    %23 = vector.broadcast %cst_12 : f32 to vector<48x162xf32>
    %24 = arith.maximumf %22, %23 : vector<48x162xf32>
    %c0_13 = arith.constant 0 : index
    %c0_14 = arith.constant 0 : index
    %25 = vector.load %arg5[%c0_13, %c0_14] : memref<24x48xf32, #tpu.memory_space<vmem>>, vector<24x48xf32>
    %cst_15 = arith.constant dense<0.000000e+00> : vector<24x162xf32>
    %26 = tpu.matmul %25, %24, %cst_15 {dimension_numbers = #tpu.dot_dimension_numbers<[1], [0], [0], [1], [0, 0, 1, 1], [], []>} : vector<24x48xf32>, vector<48x162xf32>, vector<24x162xf32> -> vector<24x162xf32>
    %c0_16 = arith.constant 0 : index
    %c0_17 = arith.constant 0 : index
    %27 = vector.load %arg6[%c0_16, %c0_17] : memref<24x1xf32, #tpu.memory_space<vmem>>, vector<24x1xf32>
    %28 = vector.broadcast %27 : vector<24x1xf32> to vector<24x162xf32>
    %29 = arith.addf %26, %28 : vector<24x162xf32>
    %30 = vector.extract_strided_slice %29 {offsets = [0, 17], sizes = [8, 128], strides = [1, 1]} : vector<24x162xf32> to vector<8x128xf32>
    %cst_18 = arith.constant 0.353553385 : f32
    %31 = vector.broadcast %cst_18 : f32 to vector<8x128xf32>
    %32 = arith.mulf %30, %31 : vector<8x128xf32>
    %33 = vector.extract_strided_slice %29 {offsets = [8, 0], sizes = [8, 162], strides = [1, 1]} : vector<24x162xf32> to vector<8x162xf32>
    %34 = vector.extract_strided_slice %29 {offsets = [16, 0], sizes = [8, 162], strides = [1, 1]} : vector<24x162xf32> to vector<8x162xf32>
    %c0_19 = arith.constant 0 : index
    %c0_20 = arith.constant 0 : index
    %35 = vector.load %arg7[%c0_19, %c0_20] : memref<9x8xf32, #tpu.memory_space<vmem>>, vector<9x8xf32>
    %cst_21 = arith.constant dense<0.000000e+00> : vector<9x128xf32>
    %36 = tpu.matmul %35, %32, %cst_21 {dimension_numbers = #tpu.dot_dimension_numbers<[1], [0], [0], [1], [0, 0, 1, 1], [], []>} : vector<9x8xf32>, vector<8x128xf32>, vector<9x128xf32> -> vector<9x128xf32>
    %c8_i32 = arith.constant 8 : i32
    %37 = arith.muli %arg1, %c8_i32 : i32
    %c0_22 = arith.constant 0 : index
    %c0_23 = arith.constant 0 : index
    %38 = vector.load %arg8[%c0_22, %c0_23] : memref<1x128xi32, #tpu.memory_space<vmem>>, vector<1x128xi32>
    %39 = vector.broadcast %37 : i32 to vector<1x128xi32>
    %40 = arith.addi %39, %38 : vector<1x128xi32>
    %c0_24 = arith.constant 0 : index
    %c0_25 = arith.constant 0 : index
    %41 = vector.load %arg9[%c0_24, %c0_25] : memref<1x128xi32, #tpu.memory_space<vmem>>, vector<1x128xi32>
    %42 = vector.extract_strided_slice %33 {offsets = [0, 0], sizes = [8, 128], strides = [1, 1]} : vector<8x162xf32> to vector<8x128xf32>
    %43 = arith.mulf %32, %42 : vector<8x128xf32>
    %cst_26 = arith.constant dense<0.000000e+00> : vector<128xf32>
    %44 = vector.multi_reduction <add>, %43, %cst_26 [0] : vector<8x128xf32> to vector<128xf32>
    %45 = vector.shape_cast %44 : vector<128xf32> to vector<1x128xf32>
    %c-1_i32 = arith.constant -1 : i32
    %46 = vector.broadcast %c-1_i32 : i32 to vector<1x128xi32>
    %47 = arith.addi %40, %46 : vector<1x128xi32>
    %c0_i32 = arith.constant 0 : i32
    %48 = vector.broadcast %c0_i32 : i32 to vector<1x128xi32>
    %49 = arith.cmpi sge, %47, %48 : vector<1x128xi32>
    %c-1_i32_27 = arith.constant -1 : i32
    %50 = vector.broadcast %c-1_i32_27 : i32 to vector<1x128xi32>
    %51 = arith.addi %40, %50 : vector<1x128xi32>
    %c16_i32 = arith.constant 16 : i32
    %52 = vector.broadcast %c16_i32 : i32 to vector<1x128xi32>
    %53 = arith.cmpi slt, %51, %52 : vector<1x128xi32>
    %54 = arith.andi %49, %53 : vector<1x128xi1>
    %c-1_i32_28 = arith.constant -1 : i32
    %55 = vector.broadcast %c-1_i32_28 : i32 to vector<1x128xi32>
    %56 = arith.addi %41, %55 : vector<1x128xi32>
    %c0_i32_29 = arith.constant 0 : i32
    %57 = vector.broadcast %c0_i32_29 : i32 to vector<1x128xi32>
    %58 = arith.cmpi sge, %56, %57 : vector<1x128xi32>
    %59 = arith.andi %54, %58 : vector<1x128xi1>
    %c-1_i32_30 = arith.constant -1 : i32
    %60 = vector.broadcast %c-1_i32_30 : i32 to vector<1x128xi32>
    %61 = arith.addi %41, %60 : vector<1x128xi32>
    %c16_i32_31 = arith.constant 16 : i32
    %62 = vector.broadcast %c16_i32_31 : i32 to vector<1x128xi32>
    %63 = arith.cmpi slt, %61, %62 : vector<1x128xi32>
    %64 = arith.andi %59, %63 : vector<1x128xi1>
    %65 = arith.extui %64 : vector<1x128xi1> to vector<1x128xi32>
    %66 = arith.sitofp %65 : vector<1x128xi32> to vector<1x128xf32>
    %67 = arith.mulf %45, %66 : vector<1x128xf32>
    %68 = vector.extract_strided_slice %33 {offsets = [0, 1], sizes = [8, 128], strides = [1, 1]} : vector<8x162xf32> to vector<8x128xf32>
    %69 = arith.mulf %32, %68 : vector<8x128xf32>
    %cst_32 = arith.constant dense<0.000000e+00> : vector<128xf32>
    %70 = vector.multi_reduction <add>, %69, %cst_32 [0] : vector<8x128xf32> to vector<128xf32>
    %71 = vector.shape_cast %70 : vector<128xf32> to vector<1x128xf32>
    %c-1_i32_33 = arith.constant -1 : i32
    %72 = vector.broadcast %c-1_i32_33 : i32 to vector<1x128xi32>
    %73 = arith.addi %40, %72 : vector<1x128xi32>
    %c0_i32_34 = arith.constant 0 : i32
    %74 = vector.broadcast %c0_i32_34 : i32 to vector<1x128xi32>
    %75 = arith.cmpi sge, %73, %74 : vector<1x128xi32>
    %c-1_i32_35 = arith.constant -1 : i32
    %76 = vector.broadcast %c-1_i32_35 : i32 to vector<1x128xi32>
    %77 = arith.addi %40, %76 : vector<1x128xi32>
    %c16_i32_36 = arith.constant 16 : i32
    %78 = vector.broadcast %c16_i32_36 : i32 to vector<1x128xi32>
    %79 = arith.cmpi slt, %77, %78 : vector<1x128xi32>
    %80 = arith.andi %75, %79 : vector<1x128xi1>
    %c0_i32_37 = arith.constant 0 : i32
    %81 = vector.broadcast %c0_i32_37 : i32 to vector<1x128xi32>
    %82 = arith.addi %41, %81 : vector<1x128xi32>
    %c0_i32_38 = arith.constant 0 : i32
    %83 = vector.broadcast %c0_i32_38 : i32 to vector<1x128xi32>
    %84 = arith.cmpi sge, %82, %83 : vector<1x128xi32>
    %85 = arith.andi %80, %84 : vector<1x128xi1>
    %c0_i32_39 = arith.constant 0 : i32
    %86 = vector.broadcast %c0_i32_39 : i32 to vector<1x128xi32>
    %87 = arith.addi %41, %86 : vector<1x128xi32>
    %c16_i32_40 = arith.constant 16 : i32
    %88 = vector.broadcast %c16_i32_40 : i32 to vector<1x128xi32>
    %89 = arith.cmpi slt, %87, %88 : vector<1x128xi32>
    %90 = arith.andi %85, %89 : vector<1x128xi1>
    %91 = arith.extui %90 : vector<1x128xi1> to vector<1x128xi32>
    %92 = arith.sitofp %91 : vector<1x128xi32> to vector<1x128xf32>
    %93 = arith.mulf %71, %92 : vector<1x128xf32>
    %94 = vector.extract_strided_slice %33 {offsets = [0, 2], sizes = [8, 128], strides = [1, 1]} : vector<8x162xf32> to vector<8x128xf32>
    %95 = arith.mulf %32, %94 : vector<8x128xf32>
    %cst_41 = arith.constant dense<0.000000e+00> : vector<128xf32>
    %96 = vector.multi_reduction <add>, %95, %cst_41 [0] : vector<8x128xf32> to vector<128xf32>
    %97 = vector.shape_cast %96 : vector<128xf32> to vector<1x128xf32>
    %c-1_i32_42 = arith.constant -1 : i32
    %98 = vector.broadcast %c-1_i32_42 : i32 to vector<1x128xi32>
    %99 = arith.addi %40, %98 : vector<1x128xi32>
    %c0_i32_43 = arith.constant 0 : i32
    %100 = vector.broadcast %c0_i32_43 : i32 to vector<1x128xi32>
    %101 = arith.cmpi sge, %99, %100 : vector<1x128xi32>
    %c-1_i32_44 = arith.constant -1 : i32
    %102 = vector.broadcast %c-1_i32_44 : i32 to vector<1x128xi32>
    %103 = arith.addi %40, %102 : vector<1x128xi32>
    %c16_i32_45 = arith.constant 16 : i32
    %104 = vector.broadcast %c16_i32_45 : i32 to vector<1x128xi32>
    %105 = arith.cmpi slt, %103, %104 : vector<1x128xi32>
    %106 = arith.andi %101, %105 : vector<1x128xi1>
    %c1_i32 = arith.constant 1 : i32
    %107 = vector.broadcast %c1_i32 : i32 to vector<1x128xi32>
    %108 = arith.addi %41, %107 : vector<1x128xi32>
    %c0_i32_46 = arith.constant 0 : i32
    %109 = vector.broadcast %c0_i32_46 : i32 to vector<1x128xi32>
    %110 = arith.cmpi sge, %108, %109 : vector<1x128xi32>
    %111 = arith.andi %106, %110 : vector<1x128xi1>
    %c1_i32_47 = arith.constant 1 : i32
    %112 = vector.broadcast %c1_i32_47 : i32 to vector<1x128xi32>
    %113 = arith.addi %41, %112 : vector<1x128xi32>
    %c16_i32_48 = arith.constant 16 : i32
    %114 = vector.broadcast %c16_i32_48 : i32 to vector<1x128xi32>
    %115 = arith.cmpi slt, %113, %114 : vector<1x128xi32>
    %116 = arith.andi %111, %115 : vector<1x128xi1>
    %117 = arith.extui %116 : vector<1x128xi1> to vector<1x128xi32>
    %118 = arith.sitofp %117 : vector<1x128xi32> to vector<1x128xf32>
    %119 = arith.mulf %97, %118 : vector<1x128xf32>
    %120 = vector.extract_strided_slice %33 {offsets = [0, 16], sizes = [8, 128], strides = [1, 1]} : vector<8x162xf32> to vector<8x128xf32>
    %121 = arith.mulf %32, %120 : vector<8x128xf32>
    %cst_49 = arith.constant dense<0.000000e+00> : vector<128xf32>
    %122 = vector.multi_reduction <add>, %121, %cst_49 [0] : vector<8x128xf32> to vector<128xf32>
    %123 = vector.shape_cast %122 : vector<128xf32> to vector<1x128xf32>
    %c0_i32_50 = arith.constant 0 : i32
    %124 = vector.broadcast %c0_i32_50 : i32 to vector<1x128xi32>
    %125 = arith.addi %40, %124 : vector<1x128xi32>
    %c0_i32_51 = arith.constant 0 : i32
    %126 = vector.broadcast %c0_i32_51 : i32 to vector<1x128xi32>
    %127 = arith.cmpi sge, %125, %126 : vector<1x128xi32>
    %c0_i32_52 = arith.constant 0 : i32
    %128 = vector.broadcast %c0_i32_52 : i32 to vector<1x128xi32>
    %129 = arith.addi %40, %128 : vector<1x128xi32>
    %c16_i32_53 = arith.constant 16 : i32
    %130 = vector.broadcast %c16_i32_53 : i32 to vector<1x128xi32>
    %131 = arith.cmpi slt, %129, %130 : vector<1x128xi32>
    %132 = arith.andi %127, %131 : vector<1x128xi1>
    %c-1_i32_54 = arith.constant -1 : i32
    %133 = vector.broadcast %c-1_i32_54 : i32 to vector<1x128xi32>
    %134 = arith.addi %41, %133 : vector<1x128xi32>
    %c0_i32_55 = arith.constant 0 : i32
    %135 = vector.broadcast %c0_i32_55 : i32 to vector<1x128xi32>
    %136 = arith.cmpi sge, %134, %135 : vector<1x128xi32>
    %137 = arith.andi %132, %136 : vector<1x128xi1>
    %c-1_i32_56 = arith.constant -1 : i32
    %138 = vector.broadcast %c-1_i32_56 : i32 to vector<1x128xi32>
    %139 = arith.addi %41, %138 : vector<1x128xi32>
    %c16_i32_57 = arith.constant 16 : i32
    %140 = vector.broadcast %c16_i32_57 : i32 to vector<1x128xi32>
    %141 = arith.cmpi slt, %139, %140 : vector<1x128xi32>
    %142 = arith.andi %137, %141 : vector<1x128xi1>
    %143 = arith.extui %142 : vector<1x128xi1> to vector<1x128xi32>
    %144 = arith.sitofp %143 : vector<1x128xi32> to vector<1x128xf32>
    %145 = arith.mulf %123, %144 : vector<1x128xf32>
    %146 = vector.extract_strided_slice %33 {offsets = [0, 17], sizes = [8, 128], strides = [1, 1]} : vector<8x162xf32> to vector<8x128xf32>
    %147 = arith.mulf %32, %146 : vector<8x128xf32>
    %cst_58 = arith.constant dense<0.000000e+00> : vector<128xf32>
    %148 = vector.multi_reduction <add>, %147, %cst_58 [0] : vector<8x128xf32> to vector<128xf32>
    %149 = vector.shape_cast %148 : vector<128xf32> to vector<1x128xf32>
    %c0_i32_59 = arith.constant 0 : i32
    %150 = vector.broadcast %c0_i32_59 : i32 to vector<1x128xi32>
    %151 = arith.addi %40, %150 : vector<1x128xi32>
    %c0_i32_60 = arith.constant 0 : i32
    %152 = vector.broadcast %c0_i32_60 : i32 to vector<1x128xi32>
    %153 = arith.cmpi sge, %151, %152 : vector<1x128xi32>
    %c0_i32_61 = arith.constant 0 : i32
    %154 = vector.broadcast %c0_i32_61 : i32 to vector<1x128xi32>
    %155 = arith.addi %40, %154 : vector<1x128xi32>
    %c16_i32_62 = arith.constant 16 : i32
    %156 = vector.broadcast %c16_i32_62 : i32 to vector<1x128xi32>
    %157 = arith.cmpi slt, %155, %156 : vector<1x128xi32>
    %158 = arith.andi %153, %157 : vector<1x128xi1>
    %c0_i32_63 = arith.constant 0 : i32
    %159 = vector.broadcast %c0_i32_63 : i32 to vector<1x128xi32>
    %160 = arith.addi %41, %159 : vector<1x128xi32>
    %c0_i32_64 = arith.constant 0 : i32
    %161 = vector.broadcast %c0_i32_64 : i32 to vector<1x128xi32>
    %162 = arith.cmpi sge, %160, %161 : vector<1x128xi32>
    %163 = arith.andi %158, %162 : vector<1x128xi1>
    %c0_i32_65 = arith.constant 0 : i32
    %164 = vector.broadcast %c0_i32_65 : i32 to vector<1x128xi32>
    %165 = arith.addi %41, %164 : vector<1x128xi32>
    %c16_i32_66 = arith.constant 16 : i32
    %166 = vector.broadcast %c16_i32_66 : i32 to vector<1x128xi32>
    %167 = arith.cmpi slt, %165, %166 : vector<1x128xi32>
    %168 = arith.andi %163, %167 : vector<1x128xi1>
    %169 = arith.extui %168 : vector<1x128xi1> to vector<1x128xi32>
    %170 = arith.sitofp %169 : vector<1x128xi32> to vector<1x128xf32>
    %171 = arith.mulf %149, %170 : vector<1x128xf32>
    %172 = vector.extract_strided_slice %33 {offsets = [0, 18], sizes = [8, 128], strides = [1, 1]} : vector<8x162xf32> to vector<8x128xf32>
    %173 = arith.mulf %32, %172 : vector<8x128xf32>
    %cst_67 = arith.constant dense<0.000000e+00> : vector<128xf32>
    %174 = vector.multi_reduction <add>, %173, %cst_67 [0] : vector<8x128xf32> to vector<128xf32>
    %175 = vector.shape_cast %174 : vector<128xf32> to vector<1x128xf32>
    %c0_i32_68 = arith.constant 0 : i32
    %176 = vector.broadcast %c0_i32_68 : i32 to vector<1x128xi32>
    %177 = arith.addi %40, %176 : vector<1x128xi32>
    %c0_i32_69 = arith.constant 0 : i32
    %178 = vector.broadcast %c0_i32_69 : i32 to vector<1x128xi32>
    %179 = arith.cmpi sge, %177, %178 : vector<1x128xi32>
    %c0_i32_70 = arith.constant 0 : i32
    %180 = vector.broadcast %c0_i32_70 : i32 to vector<1x128xi32>
    %181 = arith.addi %40, %180 : vector<1x128xi32>
    %c16_i32_71 = arith.constant 16 : i32
    %182 = vector.broadcast %c16_i32_71 : i32 to vector<1x128xi32>
    %183 = arith.cmpi slt, %181, %182 : vector<1x128xi32>
    %184 = arith.andi %179, %183 : vector<1x128xi1>
    %c1_i32_72 = arith.constant 1 : i32
    %185 = vector.broadcast %c1_i32_72 : i32 to vector<1x128xi32>
    %186 = arith.addi %41, %185 : vector<1x128xi32>
    %c0_i32_73 = arith.constant 0 : i32
    %187 = vector.broadcast %c0_i32_73 : i32 to vector<1x128xi32>
    %188 = arith.cmpi sge, %186, %187 : vector<1x128xi32>
    %189 = arith.andi %184, %188 : vector<1x128xi1>
    %c1_i32_74 = arith.constant 1 : i32
    %190 = vector.broadcast %c1_i32_74 : i32 to vector<1x128xi32>
    %191 = arith.addi %41, %190 : vector<1x128xi32>
    %c16_i32_75 = arith.constant 16 : i32
    %192 = vector.broadcast %c16_i32_75 : i32 to vector<1x128xi32>
    %193 = arith.cmpi slt, %191, %192 : vector<1x128xi32>
    %194 = arith.andi %189, %193 : vector<1x128xi1>
    %195 = arith.extui %194 : vector<1x128xi1> to vector<1x128xi32>
    %196 = arith.sitofp %195 : vector<1x128xi32> to vector<1x128xf32>
    %197 = arith.mulf %175, %196 : vector<1x128xf32>
    %198 = vector.extract_strided_slice %33 {offsets = [0, 32], sizes = [8, 128], strides = [1, 1]} : vector<8x162xf32> to vector<8x128xf32>
    %199 = arith.mulf %32, %198 : vector<8x128xf32>
    %cst_76 = arith.constant dense<0.000000e+00> : vector<128xf32>
    %200 = vector.multi_reduction <add>, %199, %cst_76 [0] : vector<8x128xf32> to vector<128xf32>
    %201 = vector.shape_cast %200 : vector<128xf32> to vector<1x128xf32>
    %c1_i32_77 = arith.constant 1 : i32
    %202 = vector.broadcast %c1_i32_77 : i32 to vector<1x128xi32>
    %203 = arith.addi %40, %202 : vector<1x128xi32>
    %c0_i32_78 = arith.constant 0 : i32
    %204 = vector.broadcast %c0_i32_78 : i32 to vector<1x128xi32>
    %205 = arith.cmpi sge, %203, %204 : vector<1x128xi32>
    %c1_i32_79 = arith.constant 1 : i32
    %206 = vector.broadcast %c1_i32_79 : i32 to vector<1x128xi32>
    %207 = arith.addi %40, %206 : vector<1x128xi32>
    %c16_i32_80 = arith.constant 16 : i32
    %208 = vector.broadcast %c16_i32_80 : i32 to vector<1x128xi32>
    %209 = arith.cmpi slt, %207, %208 : vector<1x128xi32>
    %210 = arith.andi %205, %209 : vector<1x128xi1>
    %c-1_i32_81 = arith.constant -1 : i32
    %211 = vector.broadcast %c-1_i32_81 : i32 to vector<1x128xi32>
    %212 = arith.addi %41, %211 : vector<1x128xi32>
    %c0_i32_82 = arith.constant 0 : i32
    %213 = vector.broadcast %c0_i32_82 : i32 to vector<1x128xi32>
    %214 = arith.cmpi sge, %212, %213 : vector<1x128xi32>
    %215 = arith.andi %210, %214 : vector<1x128xi1>
    %c-1_i32_83 = arith.constant -1 : i32
    %216 = vector.broadcast %c-1_i32_83 : i32 to vector<1x128xi32>
    %217 = arith.addi %41, %216 : vector<1x128xi32>
    %c16_i32_84 = arith.constant 16 : i32
    %218 = vector.broadcast %c16_i32_84 : i32 to vector<1x128xi32>
    %219 = arith.cmpi slt, %217, %218 : vector<1x128xi32>
    %220 = arith.andi %215, %219 : vector<1x128xi1>
    %221 = arith.extui %220 : vector<1x128xi1> to vector<1x128xi32>
    %222 = arith.sitofp %221 : vector<1x128xi32> to vector<1x128xf32>
    %223 = arith.mulf %201, %222 : vector<1x128xf32>
    %224 = vector.extract_strided_slice %33 {offsets = [0, 33], sizes = [8, 128], strides = [1, 1]} : vector<8x162xf32> to vector<8x128xf32>
    %225 = arith.mulf %32, %224 : vector<8x128xf32>
    %cst_85 = arith.constant dense<0.000000e+00> : vector<128xf32>
    %226 = vector.multi_reduction <add>, %225, %cst_85 [0] : vector<8x128xf32> to vector<128xf32>
    %227 = vector.shape_cast %226 : vector<128xf32> to vector<1x128xf32>
    %c1_i32_86 = arith.constant 1 : i32
    %228 = vector.broadcast %c1_i32_86 : i32 to vector<1x128xi32>
    %229 = arith.addi %40, %228 : vector<1x128xi32>
    %c0_i32_87 = arith.constant 0 : i32
    %230 = vector.broadcast %c0_i32_87 : i32 to vector<1x128xi32>
    %231 = arith.cmpi sge, %229, %230 : vector<1x128xi32>
    %c1_i32_88 = arith.constant 1 : i32
    %232 = vector.broadcast %c1_i32_88 : i32 to vector<1x128xi32>
    %233 = arith.addi %40, %232 : vector<1x128xi32>
    %c16_i32_89 = arith.constant 16 : i32
    %234 = vector.broadcast %c16_i32_89 : i32 to vector<1x128xi32>
    %235 = arith.cmpi slt, %233, %234 : vector<1x128xi32>
    %236 = arith.andi %231, %235 : vector<1x128xi1>
    %c0_i32_90 = arith.constant 0 : i32
    %237 = vector.broadcast %c0_i32_90 : i32 to vector<1x128xi32>
    %238 = arith.addi %41, %237 : vector<1x128xi32>
    %c0_i32_91 = arith.constant 0 : i32
    %239 = vector.broadcast %c0_i32_91 : i32 to vector<1x128xi32>
    %240 = arith.cmpi sge, %238, %239 : vector<1x128xi32>
    %241 = arith.andi %236, %240 : vector<1x128xi1>
    %c0_i32_92 = arith.constant 0 : i32
    %242 = vector.broadcast %c0_i32_92 : i32 to vector<1x128xi32>
    %243 = arith.addi %41, %242 : vector<1x128xi32>
    %c16_i32_93 = arith.constant 16 : i32
    %244 = vector.broadcast %c16_i32_93 : i32 to vector<1x128xi32>
    %245 = arith.cmpi slt, %243, %244 : vector<1x128xi32>
    %246 = arith.andi %241, %245 : vector<1x128xi1>
    %247 = arith.extui %246 : vector<1x128xi1> to vector<1x128xi32>
    %248 = arith.sitofp %247 : vector<1x128xi32> to vector<1x128xf32>
    %249 = arith.mulf %227, %248 : vector<1x128xf32>
    %250 = vector.extract_strided_slice %33 {offsets = [0, 34], sizes = [8, 128], strides = [1, 1]} : vector<8x162xf32> to vector<8x128xf32>
    %251 = arith.mulf %32, %250 : vector<8x128xf32>
    %cst_94 = arith.constant dense<0.000000e+00> : vector<128xf32>
    %252 = vector.multi_reduction <add>, %251, %cst_94 [0] : vector<8x128xf32> to vector<128xf32>
    %253 = vector.shape_cast %252 : vector<128xf32> to vector<1x128xf32>
    %c1_i32_95 = arith.constant 1 : i32
    %254 = vector.broadcast %c1_i32_95 : i32 to vector<1x128xi32>
    %255 = arith.addi %40, %254 : vector<1x128xi32>
    %c0_i32_96 = arith.constant 0 : i32
    %256 = vector.broadcast %c0_i32_96 : i32 to vector<1x128xi32>
    %257 = arith.cmpi sge, %255, %256 : vector<1x128xi32>
    %c1_i32_97 = arith.constant 1 : i32
    %258 = vector.broadcast %c1_i32_97 : i32 to vector<1x128xi32>
    %259 = arith.addi %40, %258 : vector<1x128xi32>
    %c16_i32_98 = arith.constant 16 : i32
    %260 = vector.broadcast %c16_i32_98 : i32 to vector<1x128xi32>
    %261 = arith.cmpi slt, %259, %260 : vector<1x128xi32>
    %262 = arith.andi %257, %261 : vector<1x128xi1>
    %c1_i32_99 = arith.constant 1 : i32
    %263 = vector.broadcast %c1_i32_99 : i32 to vector<1x128xi32>
    %264 = arith.addi %41, %263 : vector<1x128xi32>
    %c0_i32_100 = arith.constant 0 : i32
    %265 = vector.broadcast %c0_i32_100 : i32 to vector<1x128xi32>
    %266 = arith.cmpi sge, %264, %265 : vector<1x128xi32>
    %267 = arith.andi %262, %266 : vector<1x128xi1>
    %c1_i32_101 = arith.constant 1 : i32
    %268 = vector.broadcast %c1_i32_101 : i32 to vector<1x128xi32>
    %269 = arith.addi %41, %268 : vector<1x128xi32>
    %c16_i32_102 = arith.constant 16 : i32
    %270 = vector.broadcast %c16_i32_102 : i32 to vector<1x128xi32>
    %271 = arith.cmpi slt, %269, %270 : vector<1x128xi32>
    %272 = arith.andi %267, %271 : vector<1x128xi1>
    %273 = arith.extui %272 : vector<1x128xi1> to vector<1x128xi32>
    %274 = arith.sitofp %273 : vector<1x128xi32> to vector<1x128xf32>
    %275 = arith.mulf %253, %274 : vector<1x128xf32>
    %276 = tpu.concatenate %67, %93, %119, %145, %171, %197, %223, %249, %275 in 0 : vector<1x128xf32>, vector<1x128xf32>, vector<1x128xf32>, vector<1x128xf32>, vector<1x128xf32>, vector<1x128xf32>, vector<1x128xf32>, vector<1x128xf32>, vector<1x128xf32> -> vector<9x128xf32>
    %277 = arith.addf %276, %36 : vector<9x128xf32>
    %278 = tpu.concatenate %66, %92, %118, %144, %170, %196, %222, %248, %274 in 0 : vector<1x128xf32>, vector<1x128xf32>, vector<1x128xf32>, vector<1x128xf32>, vector<1x128xf32>, vector<1x128xf32>, vector<1x128xf32>, vector<1x128xf32>, vector<1x128xf32> -> vector<9x128xf32>
    %cst_103 = arith.constant dense<0xFF800000> : vector<128xf32>
    %279 = vector.multi_reduction <maximumf>, %277, %cst_103 [0] : vector<9x128xf32> to vector<128xf32>
    %280 = vector.shape_cast %279 : vector<128xf32> to vector<1x128xf32>
    %281 = vector.broadcast %280 : vector<1x128xf32> to vector<9x128xf32>
    %282 = arith.subf %277, %281 : vector<9x128xf32>
    %283 = math.exp %282 : vector<9x128xf32>
    %cst_104 = arith.constant dense<0.000000e+00> : vector<128xf32>
    %284 = vector.multi_reduction <add>, %283, %cst_104 [0] : vector<9x128xf32> to vector<128xf32>
    %285 = vector.shape_cast %284 : vector<128xf32> to vector<1x128xf32>
    %286 = tpu.reciprocal %285 {approx = true} : vector<1x128xf32> -> vector<1x128xf32>
    %287 = arith.mulf %285, %286 : vector<1x128xf32>
    %cst_105 = arith.constant 2.000000e+00 : f32
    %288 = vector.broadcast %cst_105 : f32 to vector<1x128xf32>
    %289 = arith.subf %288, %287 : vector<1x128xf32>
    %290 = arith.mulf %286, %289 : vector<1x128xf32>
    %291 = vector.broadcast %290 : vector<1x128xf32> to vector<9x128xf32>
    %292 = arith.mulf %283, %291 : vector<9x128xf32>
    %293 = arith.mulf %292, %278 : vector<9x128xf32>
    %cst_106 = arith.constant 0.000000e+00 : f32
    %294 = vector.broadcast %cst_106 : f32 to vector<8x128xf32>
    %295 = vector.extract_strided_slice %34 {offsets = [0, 0], sizes = [8, 128], strides = [1, 1]} : vector<8x162xf32> to vector<8x128xf32>
    %296 = vector.extract_strided_slice %293 {offsets = [0, 0], sizes = [1, 128], strides = [1, 1]} : vector<9x128xf32> to vector<1x128xf32>
    %297 = vector.broadcast %296 : vector<1x128xf32> to vector<8x128xf32>
    %298 = arith.mulf %295, %297 : vector<8x128xf32>
    %299 = arith.addf %294, %298 : vector<8x128xf32>
    %300 = vector.extract_strided_slice %34 {offsets = [0, 1], sizes = [8, 128], strides = [1, 1]} : vector<8x162xf32> to vector<8x128xf32>
    %301 = vector.extract_strided_slice %293 {offsets = [1, 0], sizes = [1, 128], strides = [1, 1]} : vector<9x128xf32> to vector<1x128xf32>
    %302 = vector.broadcast %301 : vector<1x128xf32> to vector<8x128xf32>
    %303 = arith.mulf %300, %302 : vector<8x128xf32>
    %304 = arith.addf %299, %303 : vector<8x128xf32>
    %305 = vector.extract_strided_slice %34 {offsets = [0, 2], sizes = [8, 128], strides = [1, 1]} : vector<8x162xf32> to vector<8x128xf32>
    %306 = vector.extract_strided_slice %293 {offsets = [2, 0], sizes = [1, 128], strides = [1, 1]} : vector<9x128xf32> to vector<1x128xf32>
    %307 = vector.broadcast %306 : vector<1x128xf32> to vector<8x128xf32>
    %308 = arith.mulf %305, %307 : vector<8x128xf32>
    %309 = arith.addf %304, %308 : vector<8x128xf32>
    %310 = vector.extract_strided_slice %34 {offsets = [0, 16], sizes = [8, 128], strides = [1, 1]} : vector<8x162xf32> to vector<8x128xf32>
    %311 = vector.extract_strided_slice %293 {offsets = [3, 0], sizes = [1, 128], strides = [1, 1]} : vector<9x128xf32> to vector<1x128xf32>
    %312 = vector.broadcast %311 : vector<1x128xf32> to vector<8x128xf32>
    %313 = arith.mulf %310, %312 : vector<8x128xf32>
    %314 = arith.addf %309, %313 : vector<8x128xf32>
    %315 = vector.extract_strided_slice %34 {offsets = [0, 17], sizes = [8, 128], strides = [1, 1]} : vector<8x162xf32> to vector<8x128xf32>
    %316 = vector.extract_strided_slice %293 {offsets = [4, 0], sizes = [1, 128], strides = [1, 1]} : vector<9x128xf32> to vector<1x128xf32>
    %317 = vector.broadcast %316 : vector<1x128xf32> to vector<8x128xf32>
    %318 = arith.mulf %315, %317 : vector<8x128xf32>
    %319 = arith.addf %314, %318 : vector<8x128xf32>
    %320 = vector.extract_strided_slice %34 {offsets = [0, 18], sizes = [8, 128], strides = [1, 1]} : vector<8x162xf32> to vector<8x128xf32>
    %321 = vector.extract_strided_slice %293 {offsets = [5, 0], sizes = [1, 128], strides = [1, 1]} : vector<9x128xf32> to vector<1x128xf32>
    %322 = vector.broadcast %321 : vector<1x128xf32> to vector<8x128xf32>
    %323 = arith.mulf %320, %322 : vector<8x128xf32>
    %324 = arith.addf %319, %323 : vector<8x128xf32>
    %325 = vector.extract_strided_slice %34 {offsets = [0, 32], sizes = [8, 128], strides = [1, 1]} : vector<8x162xf32> to vector<8x128xf32>
    %326 = vector.extract_strided_slice %293 {offsets = [6, 0], sizes = [1, 128], strides = [1, 1]} : vector<9x128xf32> to vector<1x128xf32>
    %327 = vector.broadcast %326 : vector<1x128xf32> to vector<8x128xf32>
    %328 = arith.mulf %325, %327 : vector<8x128xf32>
    %329 = arith.addf %324, %328 : vector<8x128xf32>
    %330 = vector.extract_strided_slice %34 {offsets = [0, 33], sizes = [8, 128], strides = [1, 1]} : vector<8x162xf32> to vector<8x128xf32>
    %331 = vector.extract_strided_slice %293 {offsets = [7, 0], sizes = [1, 128], strides = [1, 1]} : vector<9x128xf32> to vector<1x128xf32>
    %332 = vector.broadcast %331 : vector<1x128xf32> to vector<8x128xf32>
    %333 = arith.mulf %330, %332 : vector<8x128xf32>
    %334 = arith.addf %329, %333 : vector<8x128xf32>
    %335 = vector.extract_strided_slice %34 {offsets = [0, 34], sizes = [8, 128], strides = [1, 1]} : vector<8x162xf32> to vector<8x128xf32>
    %336 = vector.extract_strided_slice %293 {offsets = [8, 0], sizes = [1, 128], strides = [1, 1]} : vector<9x128xf32> to vector<1x128xf32>
    %337 = vector.broadcast %336 : vector<1x128xf32> to vector<8x128xf32>
    %338 = arith.mulf %335, %337 : vector<8x128xf32>
    %339 = arith.addf %334, %338 : vector<8x128xf32>
    %c0_107 = arith.constant 0 : index
    %c0_108 = arith.constant 0 : index
    %c0_109 = arith.constant 0 : index
    %340 = vector.load %arg10[%c0_107, %c0_108, %c0_109] : memref<1x8x128xf32, #tpu.memory_space<vmem>>, vector<1x8x128xf32>
    %341 = vector.shape_cast %340 : vector<1x8x128xf32> to vector<8x128xf32>
    %342 = vector.shape_cast %339 : vector<8x128xf32> to vector<1x8x128xf32>
    tpu.vector_store %arg10[%c0_107, %c0_108, %c0_109], %342 {strides = array<i32>} : memref<1x8x128xf32, #tpu.memory_space<vmem>>, vector<1x8x128xf32>,
    return
  }
  func.func @transform_0(%arg0: i32, %arg1: i32) -> (i32, i32, i32, i32) {
    %c0_i32 = arith.constant 0 : i32
    %c0_i32_0 = arith.constant 0 : i32
    %c0_i32_1 = arith.constant 0 : i32
    return %arg0, %arg1, %c0_i32, %c0_i32_0 : i32, i32, i32, i32
  }
  func.func @transform_1(%arg0: i32, %arg1: i32) -> (i32, i32) {
    %c0_i32 = arith.constant 0 : i32
    %c0_i32_0 = arith.constant 0 : i32
    %c0_i32_1 = arith.constant 0 : i32
    return %c0_i32, %c0_i32_0 : i32, i32
  }
  func.func @transform_2(%arg0: i32, %arg1: i32) -> (i32, i32) {
    %c0_i32 = arith.constant 0 : i32
    %c0_i32_0 = arith.constant 0 : i32
    %c0_i32_1 = arith.constant 0 : i32
    return %c0_i32, %c0_i32_0 : i32, i32
  }
  func.func @transform_3(%arg0: i32, %arg1: i32) -> (i32, i32) {
    %c0_i32 = arith.constant 0 : i32
    %c0_i32_0 = arith.constant 0 : i32
    %c0_i32_1 = arith.constant 0 : i32
    return %c0_i32, %c0_i32_0 : i32, i32
  }
  func.func @transform_4(%arg0: i32, %arg1: i32) -> (i32, i32) {
    %c0_i32 = arith.constant 0 : i32
    %c0_i32_0 = arith.constant 0 : i32
    %c0_i32_1 = arith.constant 0 : i32
    return %c0_i32, %c0_i32_0 : i32, i32
  }
  func.func @transform_5(%arg0: i32, %arg1: i32) -> (i32, i32) {
    %c0_i32 = arith.constant 0 : i32
    %c0_i32_0 = arith.constant 0 : i32
    %c0_i32_1 = arith.constant 0 : i32
    return %c0_i32, %c0_i32_0 : i32, i32
  }
  func.func @transform_6(%arg0: i32, %arg1: i32) -> (i32, i32) {
    %c0_i32 = arith.constant 0 : i32
    %c0_i32_0 = arith.constant 0 : i32
    %c0_i32_1 = arith.constant 0 : i32
    return %c0_i32, %c0_i32_0 : i32, i32
  }
  func.func @transform_7(%arg0: i32, %arg1: i32) -> (i32, i32) {
    %c0_i32 = arith.constant 0 : i32
    %c0_i32_0 = arith.constant 0 : i32
    %c0_i32_1 = arith.constant 0 : i32
    return %c0_i32, %c0_i32_0 : i32, i32
  }
  func.func @transform_8(%arg0: i32, %arg1: i32) -> (i32, i32, i32) {
    %c0_i32 = arith.constant 0 : i32
    %c0_i32_0 = arith.constant 0 : i32
    return %arg0, %c0_i32, %arg1 : i32, i32, i32
  }
}

</mosaic_0001>

<bundles_post_ra>
// kernel: tpu_custom_call.1
= control target key start
LH: loop header
LB: loop body
LE: loop exit
PB: predicated region body
PF: predicated region fallthrough
CT: control target
= control target key end

     0   :  { %13 = vsyncpa [#allocation3], 0  ;;  %s2485_s0 = inlined_call_operand.vmem [shape: f32[2,2,8,162], index: 0, kind: input, shape index: {}]   ;;  %s2486_s1 = inlined_call_operand.vmem [shape: f32[48,8], index: 1, kind: input, shape index: {}]   ;;  %s2487_s2 = inlined_call_operand.vmem [shape: f32[48,1], index: 2, kind: input, shape index: {}]   ;;  %s2488_s3 = inlined_call_operand.vmem [shape: f32[24,48], index: 3, kind: input, shape index: {}]   ;;  %s2489_s4 = inlined_call_operand.vmem [shape: f32[24,1], index: 4, kind: input, shape index: {}]   ;;  %s2490_s5 = inlined_call_operand.vmem [shape: f32[9,8], index: 5, kind: input, shape index: {}]   ;;  %s2491_s6 = inlined_call_operand.vmem [shape: s32[1,128], index: 6, kind: input, shape index: {}]   ;;  %s2492_s7 = inlined_call_operand.vmem [shape: s32[1,128], index: 7, kind: input, shape index: {}]   ;;  %s2493_s8 = inlined_call_operand.hbm [shape: f32[2,8,256], index: 8, kind: output, shape index: {}]  }
   0x1   :  { %15 = vsyncpa [#allocation3 + $0x1], 0  ;;  %s1948_s27 = smov 0   ;;  %s1950_s28 = smov 0  }
   0x2   :  { %s1952_s29 = smov 0   ;;  %s1954_s30 = smov 0  }
   0x3   :  { %s1956_s9 = smov 0   ;;  %s1958_s10 = smov 0  }
   0x4   :  { %s1960_s11 = smov 0   ;;  %s1962_s12 = smov 0  }
   0x5 LB: > { %2501 = sst [smem:[#allocation5_spill]] %s1877_s10  ;;  %s1612_s13 = sadd.s32 4294967295, %s1885_s12   ;;  %s1885_s12 = sphi %s1962_s12, %s21_s12   ;;  %s1881_s11 = sphi %s1960_s11, %s2524_s11   ;;  %s1877_s10 = sphi %s1958_s10, %s2523_s10   ;;  %s1873_s9 = sphi %s1956_s9, %s2522_s9   ;;  %s1869_s30 = sphi %s1954_s30, %s2521_s30   ;;  %s1865_s29 = sphi %s1952_s29, %s2527_s29   ;;  %s1861_s28 = sphi %s1950_s28, %s2526_s28   ;;  %s1857_s27 = sphi %s1948_s27, %s2525_s27  }
   0x6   : > { %2502 = sst [smem:[#allocation6_spill]] %s1881_s11  ;;  %s1613_s14 = sadd.s32 4294967294, %s1885_s12  }
   0x7   : > { %s30_s15 = sadd.s32 1, %s1877_s10  ;;  %s33_s16 = sadd.s32 1, %s1881_s11 }
   0x8   : > { %p31_p0 = scmp.ge.s32.totalorder %s30_s15, 2  ;;  %p227_p1 = scmp.ne.s32.totalorder %s1865_s29, %s1861_s28 }
   0x9   : > { %p228_p2 = scmp.eq.s32.totalorder %s1612_s13, 3  ;;  %p233_p5 = scmp.ne.s32.totalorder %s1861_s28, %s1857_s27 }
   0xa   : > { %s2529_s15 = smov (%p31_p0, %s30_s15), 0  ;;  %s2531_s16 = smov (!%p31_p0, %s33_s16), %s1881_s11 }
   0xb   : > { %2503 = sst [smem:[#allocation7_spill]] %s2529_s15  ;;  %s213_s17 = ssub.s32 %s1877_s10, %s2529_s15 }
   0xc   : > { %p1999_p3 = por %p228_p2, %p227_p1  ;;  %p35_p4 = scmp.ge.s32.totalorder %s2531_s16, 2 }
   0xd   : > { %p234_p6 = scmp.eq.s32.totalorder %s1613_s14, 3  ;;  %p1616_p7 = scmp.ge.s32.totalorder %s1885_s12, 1 }
   0xe   : > { %s2533_s16 = smov (%p35_p4, %s2531_s16), 0  ;;  %p285_p9 = scmp.lt.s32.totalorder %s1885_s12, 5 }
   0xf   : > { %2505 = sst [smem:[#allocation8_spill]] %s2533_s16  ;;  %p2008_p8 = por %p234_p6, %p233_p5 }
  0x10   : > { %s212_s20 = ssub.s32 %s1881_s11, %s2533_s16  ;;  %s217_s21 = sadd.s32 1, %s1865_s29 }
  0x11   : > { %s214_s22 = sor.u32 %s213_s17, %s212_s20  ;;  %p286_p10 = pnand %p1616_p7, %p285_p9 }
  0x12   : > { %p215_p11 = scmp.eq.s32.totalorder %s214_s22, 0  ;;  %p323_p12 = scmp.lt.s32.totalorder (!%p286_p10), %s1873_s9, 1  ;;  %v1887_v0 = vmov (!%p286_p10), 0.0   ;;  %v1888_v1 = vmov (!%p286_p10), 0   ;;  %v382_v2 = vld [vmem:[%s2487_s2] sm:$0xff] (!%p286_p10)  ;;  %v384_v3 = vld [vmem:[%s2487_s2 + $0x10] sm:$0xff] (!%p286_p10) }
  0x13   : > { %289 = sbr.rel (%p286_p10) target bundleno = 1348 (0x544), region = 52  ;;  %p325_p13 = scmp.lt.s32.totalorder (!%p286_p10), %s1869_s30, 1  ;;  %501 = vmatprep.mubr.f32.mxu0 (!%p286_p10), %v1887_v0  ;;  %645 = vmatprep.mubr.f32.mxu1 (!%p286_p10), %v1887_v0  ;;  %v383_v4 = vld [vmem:[%s2487_s2 + $0x8] sm:$0xff] (!%p286_p10)  ;;  %v385_v5 = vld [vmem:[%s2487_s2 + $0x18] sm:$0xff] (!%p286_p10)  ;;  %vm340_vm0 = vcmask (!%p286_p10), 277504   ;;  %v386_v6 = vld [vmem:[%s2487_s2 + $0x20] sm:$0xff] (!%p286_p10) }
  0x14   : > { %s2017_s23 = scalar_select %p215_p11, %s1865_s29, %s217_s21  }
  0x15   : > { %1753 = vset.pattern.permute.xlu0 (!%p286_p10), %v1888_v1  ;;  %1754 = vset.pattern.permute.xlu1 (!%p286_p10), %v1888_v1  ;;  %v387_v9 = vld [vmem:[%s2487_s2 + $0x28] sm:$0xff] (!%p286_p10)  ;;  %v553_v14 = vld [vmem:[%s2489_s4] sm:$0xff] (!%p286_p10)  ;;  %vm418_vm1 = vcmask (!%p286_p10), 64512   ;;  %v378_v53 = vld [vmem:[%s2486_s1 + $0x10] sm:$0xff] (!%p286_p10)  ;;  %vm571_vm2 = vcmask (!%p286_p10), 392192   ;;  %s1892_s22 = smov (!%p286_p10), 113  }
  0x16   : > { %2507 = sst [smem:[#allocation9_spill]] %s2017_s23  ;;  %390 = vperm.xlu0 (!%p286_p10), %1753, %v382_v2   ;;  %400 = vperm.xlu1 (!%p286_p10), %1754, %v384_v3   ;;  %v376_v51 = vld [vmem:[%s2486_s1] sm:$0xff] (!%p286_p10)  ;;  %v377_v52 = vld [vmem:[%s2486_s1 + $0x8] sm:$0xff] (!%p286_p10)  ;;  %v379_v54 = vld [vmem:[%s2486_s1 + $0x18] sm:$0xff] (!%p286_p10)  ;;  %s1890_s23 = smov (!%p286_p10), 127  }
  0x17   : > { %v380_v55 = vld [vmem:[%s2486_s1 + $0x20] sm:$0xff] (!%p286_p10)  ;;  %v381_v56 = vld [vmem:[%s2486_s1 + $0x28] sm:$0xff] (!%p286_p10)  ;;  %s1895_s17 = smov (!%p286_p10), 17   ;;  %s1897_s11 = smov (!%p286_p10), 126  }
  0x18   : > { %s1899_s10 = smov (!%p286_p10), 96   ;;  %s1900_s15 = smov (!%p286_p10), 95  }
  0x1a   : > { %s324_s24 = scalar_select %p323_p12, %s1873_s9, 1  ;;  %395 = vperm.xlu0 %1753, %v383_v4   ;;  %405 = vperm.xlu1 %1754, %v385_v5  }
  0x1b   : > { %s326_s13 = scalar_select %p325_p13, %s1869_s30, 1 }
  0x1c   : > { %s1619_s20 = sshll.u32 %s324_s24, 2  ;;  %s1632_s24 = sshll.u32 %s1869_s30, 3 }
  0x1d   : > { %s1618_s16 = sshll.u32 %s326_s13, 1 }
  0x1e   : > { %s329_s25 = sadd.s32 %s1619_s20, %s1618_s16  ;;  %410 = vperm.xlu0 %1753, %v386_v6   ;;  %415 = vperm.xlu1 %1754, %v387_v9   ;;  %s1891_s20 = smov 16  }
  0x1f   : > { %s1620_s26 = sshll.u32 %s329_s25, 3  ;;  %s1893_s25 = smov 15  }
  0x20   : > { %s331_s14 = scalar_lea.vmem %s2485_s0, %s1620_s26  ;;  %s1889_s26 = smov 111  }
  0x21   : > { %v332_v7 = vld [vmem:[%s331_s14] sm:$0xff]  ;;  %v333_v8 = vld [vmem:[%s331_s14 + $0x8] sm:$0xff]  ;;  %s1894_s14 = smov 1   ;;  %s1901_s16 = smov 94  }
  0x22   : > { %v334_v10 = vrot.slane %v332_v7, 4  ;;  %v341_v11 = vsel %vm340_vm0, %v333_v8, 0.0  ;;  %558 = vperm.xlu0 %1753, %v553_v14  }
  0x23   : > { %v342_v12 = vrot.slane %v341_v11, 4 }
  0x24   : > { %v335_v13 = vadd.f32 %v334_v10, %v332_v7 }
  0x25   : > { %v343_v15 = vadd.f32 %v342_v12, %v341_v11 }
  0x26   : > { %v336_v16 = vrot.slane %v335_v13, 2 }
  0x27   : > { %v344_v17 = vrot.slane %v343_v15, 2 }
  0x28   : > { %v337_v18 = vadd.f32 %v336_v16, %v335_v13 }
  0x29   : > { %v345_v19 = vadd.f32 %v344_v17, %v343_v15 }
  0x2a   : > { %v338_v20 = vrot.slane %v337_v18, 1 }
  0x2b   : > { %v346_v21 = vrot.slane %v345_v19, 1 }
  0x2c   : > { %v339_v22 = vadd.f32 %v338_v20, %v337_v18 }
  0x2d   : > { %v347_v23 = vadd.f32 %v346_v21, %v345_v19 }
  0x2e   : > { %v349_v24 = vmul.f32 0.125, %v339_v22 }
  0x2f   : > { %v350_v25 = vmul.f32 0.125, %v347_v23 }
  0x30   : > { %v351_v26 = vsub.f32 %v332_v7, %v349_v24 }
  0x31   : > { %v352_v27 = vsub.f32 %v333_v8, %v350_v25 }
  0x32   : > { %v353_v28 = vmul.f32 %v351_v26, %v351_v26 }
  0x33   : > { %v354_v29 = vmul.f32 %v352_v27, %v352_v27 }
  0x34   : > { %v355_v30 = vrot.slane %v353_v28, 4 }
  0x35   : > { %v361_v31 = vsel %vm340_vm0, %v354_v29, 0.0 }
  0x36   : > { %v362_v32 = vrot.slane %v361_v31, 4  ;;  %v356_v33 = vadd.f32 %v355_v30, %v353_v28 }
  0x38   : > { %v363_v34 = vadd.f32 %v362_v32, %v361_v31  ;;  %v357_v35 = vrot.slane %v356_v33, 2 }
  0x3a   : > { %v364_v36 = vrot.slane %v363_v34, 2  ;;  %v358_v37 = vadd.f32 %v357_v35, %v356_v33 }
  0x3c   : > { %v365_v38 = vadd.f32 %v364_v36, %v363_v34  ;;  %v359_v39 = vrot.slane %v358_v37, 1 }
  0x3e   : > { %v366_v40 = vrot.slane %v365_v38, 1  ;;  %v360_v41 = vadd.f32 %v359_v39, %v358_v37 }
  0x40   : > { %v367_v42 = vadd.f32 %v366_v40, %v365_v38  ;;  %v368_v43 = vmul.f32 0.125, %v360_v41 }
  0x42   : > { %v369_v44 = vmul.f32 0.125, %v367_v42  ;;  %v370_v45 = vadd.f32 1e-05, %v368_v43  ;;  %v550_v42 = vld [vmem:[%s2488_s3] sm:$0xff]  ;;  %v551_v43 = vld [vmem:[%s2488_s3 + $0x8] sm:$0xff] }
  0x44   : > { %v371_v46 = vadd.f32 1e-05, %v369_v44  ;;  %1775 = vrsqrt.f32 %v370_v45  ;;  %v552_v44 = vld [vmem:[%s2488_s3 + $0x10] sm:$0xff]  ;;  %v666_v45 = vld [vmem:[%s2490_s5] sm:$0xff] }
  0x46   : > { %1777 = vrsqrt.f32 %v371_v46 }
  0x4e   : > { %v1776_v47 = vpop.eup %1775 }
  0x4f   : > { %v374_v49 = vmul.f32 %v1776_v47, %v351_v26 }
  0x50   : > { %v1778_v48 = vpop.eup %1777 }
  0x51   : > { %v375_v50 = vmul.f32 %v1778_v48, %v352_v27 }
  0x53   : > { %437 = vmatprep.subr.mxu0 %v375_v50 }
  0x54   : > { %438 = vmatpush1.msra.mxu0 %v374_v49 }
  0x55   : > { %1621 = vmatmul.mubr.msk.f32.vlgmr.msra.gmra.mrb[0].mxu0 %vm418_vm1, %v376_v51 }
  0x56   : > { %507 = vmatprep.mubr.f32.mxu0 %v1887_v0 }
  0x59   : > { %1622 = vmatmul.mubr.msk.f32.gmra.mrb[2].mxu0 %vm418_vm1, %v377_v52 }
  0x5a   : > { %513 = vmatprep.mubr.f32.mxu0 %v1887_v0 }
  0x5d   : > { %1623 = vmatmul.mubr.msk.f32.gmra.mrb[4].mxu0 %vm418_vm1, %v378_v53 }
  0x5e   : > { %519 = vmatprep.mubr.f32.mxu0 %v1887_v0 }
  0x61   : > { %1624 = vmatmul.mubr.msk.f32.gmra.mrb[6].mxu0 %vm418_vm1, %v379_v54 }
  0x62   : > { %525 = vmatprep.mubr.f32.mxu0 %v1887_v0 }
  0x65   : > { %1625 = vmatmul.mubr.msk.f32.gmra.mrb[8].mxu0 %vm418_vm1, %v380_v55  ;;  %v554_v55 = vld [vmem:[%s2489_s4 + $0x8] sm:$0xff] }
  0x66   : > { %531 = vmatprep.mubr.f32.mxu0 %v1887_v0 }
  0x69   : > { %1626 = vmatmul.mubr.msk.f32.gmra.mrb[10].mxu0 %vm418_vm1, %v381_v56  ;;  %v759_v56 = vld [vmem:[%s2491_s6] sm:$0x1] }
  0x95   : > { %v391_v57 = vpop.permute.xlu0 %390  ;;  %v401_v3 = vpop.permute.xlu1 %400 }
  0x99   : > { %v396_v61 = vpop.permute.xlu0 %395  ;;  %v406_v14 = vpop.permute.xlu1 %405 }
  0x9d   : > { %v411_v27 = vpop.permute.xlu0 %410  ;;  %v416_v30 = vpop.permute.xlu1 %415 }
  0xa1   : > { %v559_v46 = vpop.permute.xlu0 %558 }
 0x128   : > { %v503_v58 = vpop.f32.mrb[0].mxu0 }
 0x129   : > { %v505_v59 = vpop.f32.mrb[1].mxu0  ;;  %v504_v60 = vadd.f32 %v503_v58, %v391_v57 }
 0x12a   : > { %v506_v62 = vadd.f32 %v505_v59, %v391_v57  ;;  %v760_v57 = vstv %s1632_s24  ;;  %v2115_v59 = vld [vmem:[%s2492_s7] sm:$0x1]  ;;  %s1896_s24 = smov 112  }
 0x12b   : > { %v538_v5 = vmax.f32 %v504_v60, 0.0  ;;  %v761_v58 = vadd.s32 %v760_v57, %v759_v56  ;;  %vm831_vm6 = vcmp.ge.s32.totalorder %v2115_v59, 0  ;;  %vm833_vm9 = vcmp.lt.s32.totalorder %v2115_v59, 16 }
 0x12c   : > { %v509_v63 = vpop.f32.mrb[2].mxu0  ;;  %v539_v7 = vmax.f32 %v506_v62, 0.0  ;;  %v797_v62 = vlaneseq }
 0x12d   : > { %v510_v1 = vadd.f32 %v509_v63, %v396_v61  ;;  %v511_v2 = vpop.f32.mrb[3].mxu0  ;;  %v785_v60 = vadd.s32 4294967295, %v761_v58  ;;  %vm912_vm14 = vcmp.ge.s32.totalorder %v761_v58, 0  ;;  %vm913_vm15 = vcmp.lt.s32.totalorder %v761_v58, 16 }
 0x12e   : > { %v512_v4 = vadd.f32 %v511_v2, %v396_v61  ;;  %v2118_v61 = vadd.s32 1, %v2115_v59  ;;  %v2139_v2 = vadd.s32 4294967295, %v2115_v59 }
 0x12f   : > { %v540_v6 = vmax.f32 %v510_v1, 0.0  ;;  %vm786_vm3 = vcmp.ge.s32.totalorder %v785_v60, 0  ;;  %vm787_vm4 = vcmp.lt.s32.totalorder %v785_v60, 16  ;;  %v2131_v1 = vshrl.u32 %v797_v62, 7 }
 0x130   : > { %v541_v8 = vmax.f32 %v512_v4, 0.0  ;;  %v515_v9 = vpop.f32.mrb[4].mxu0  ;;  %vm2120_vm5 = vmand %vm786_vm3, %vm787_vm4  ;;  %vm872_vm7 = vcmp.ge.s32.totalorder %v2118_v61, 0  ;;  %vm874_vm11 = vcmp.lt.s32.totalorder %v2118_v61, 16  ;;  %vm790_vm0 = vcmp.ge.s32.totalorder %v2139_v2, 0 }
 0x131   : > { %v517_v10 = vpop.f32.mrb[5].mxu0  ;;  %v1657_v11 = vpack.c.bf16 %v540_v6, %v538_v5  ;;  %v516_v13 = vadd.f32 %v515_v9, %v401_v3  ;;  %vm832_vm8 = vmand %vm2120_vm5, %vm831_vm6 }
 0x132   : > { %v1655_v12 = vpack.c.bf16 %v541_v8, %v539_v7  ;;  %v518_v15 = vadd.f32 %v517_v10, %v401_v3  ;;  %vm873_vm10 = vmand %vm2120_vm5, %vm872_vm7  ;;  %v2146_v3 = vsub.s32 0, %v2131_v1 }
 0x133   : > { %v542_v20 = vmax.f32 %v516_v13, 0.0  ;;  %vm834_vm12 = vmand %vm832_vm8, %vm833_vm9 }
 0x134   : > { %v521_v16 = vpop.f32.mrb[6].mxu0  ;;  %1656 = vmatprep.subr.bf16.mxu1 %v1655_v12  ;;  %v543_v22 = vmax.f32 %v518_v15, 0.0  ;;  %vm875_vm13 = vmand %vm873_vm10, %vm874_vm11  ;;  %v1634_v4 = vsel %vm834_vm12, 1.0, %v1887_v0  ;;  %vm1156_vm12 = vcmask 1040384  }
 0x135   : > { %v522_v17 = vadd.f32 %v521_v16, %v406_v14  ;;  %v523_v18 = vpop.f32.mrb[7].mxu0  ;;  %1658 = vmatpush1.bf16.msra.mxu1 %v1657_v11  ;;  %v1635_v5 = vsel %vm875_vm13, 1.0, %v1887_v0  ;;  %vm2152_vm3 = vmand %vm912_vm14, %vm913_vm15  ;;  %v2161_v7 = vrot.slane %v1634_v4, %v2146_v3  ;;  %vm2499_vm13 = vcmask 1041408  }
 0x136   : > { %v524_v19 = vadd.f32 %v523_v18, %v406_v14  ;;  %vm791_vm4 = vmand %vm2120_vm5, %vm790_vm0  ;;  %v2166_v8 = vrot.slane %v1635_v5, %v2146_v3  ;;  %vm2498_vm14 = vcmask 1042432   ;;  %vm2500_vm15 = vcmask 908288   ;;  %v667_v18 = vld [vmem:[%s2490_s5 + $0x8] sm:$0x1] }
 0x137   : > { %v544_v21 = vmax.f32 %v522_v17, 0.0  ;;  %vm915_vm10 = vmand %vm2152_vm3, %vm790_vm0 }
 0x138   : > { %v545_v23 = vmax.f32 %v524_v19, 0.0  ;;  %v527_v24 = vpop.f32.mrb[8].mxu0 }
 0x139   : > { %v1661_v25 = vpack.c.bf16 %v544_v21, %v542_v20  ;;  %v529_v26 = vpop.f32.mrb[9].mxu0  ;;  %v528_v29 = vadd.f32 %v527_v24, %v411_v27 }
 0x13a   : > { %v1659_v28 = vpack.c.bf16 %v545_v23, %v543_v22  ;;  %v530_v31 = vadd.f32 %v529_v26, %v411_v27  ;;  %v1021_v22 = vadd.s32 1, %v761_v58 }
 0x13b   : > { %v546_v36 = vmax.f32 %v528_v29, 0.0 }
 0x13c   : > { %v533_v32 = vpop.f32.mrb[10].mxu0  ;;  %1660 = vmatprep.subr.bf16.mxu1 %v1659_v28  ;;  %v547_v38 = vmax.f32 %v530_v31, 0.0  ;;  %v1755_v28 = vpack.i.bf16 %v2166_v8, %v2161_v7 }
 0x13d   : > { %v534_v33 = vadd.f32 %v533_v32, %v416_v30  ;;  %v535_v34 = vpop.f32.mrb[11].mxu0  ;;  %1662 = vmatpush1.bf16.msra.mxu1 %v1661_v25 }
 0x13e   : > { %v536_v35 = vadd.f32 %v535_v34, %v416_v30 }
 0x13f   : > { %v548_v37 = vmax.f32 %v534_v33, 0.0 }
 0x140   : > { %v549_v39 = vmax.f32 %v536_v35, 0.0 }
 0x141   : > { %v1665_v40 = vpack.c.bf16 %v548_v37, %v546_v36 }
 0x142   : > { %v1663_v41 = vpack.c.bf16 %v549_v39, %v547_v38 }
 0x144   : > { %1664 = vmatprep.subr.bf16.mxu1 %v1663_v41 }
 0x145   : > { %1666 = vmatpush1.bf16.msra.mxu1 %v1665_v40 }
 0x148   : > { %1627 = vmatmul.mubr.msk.f32.vlgmr.msra.gmra.mrb[0].mxu1 %vm571_vm2, %v550_v42 }
 0x149   : > { %651 = vmatprep.mubr.f32.mxu1 %v1887_v0 }
 0x14c   : > { %1628 = vmatmul.mubr.msk.f32.gmra.mrb[2].mxu1 %vm571_vm2, %v551_v43 }
 0x14d   : > { %657 = vmatprep.mubr.f32.mxu1 %v1887_v0 }
 0x150   : > { %1629 = vmatmul.mubr.msk.f32.gmra.mrb[4].mxu1 %vm571_vm2, %v552_v44  ;;  %vm792_vm2 = vcmp.lt.s32.totalorder %v2139_v2, 16 }
 0x151   : > { %1652 = vmatprep.mubr.msk.f32.mxu1 %vm418_vm1, %v666_v45  ;;  %vm793_vm8 = vmand %vm791_vm4, %vm792_vm2  ;;  %vm1023_vm4 = vcmp.lt.s32.totalorder %v1021_v22, 16 }
 0x152   : > { %v2169_v9 = vsel %vm793_vm8, 1.0, %v1887_v0  ;;  %vm916_vm5 = vmand %vm915_vm10, %vm792_vm2 }
 0x153   : > { %v1196_v10 = vsel %vm1156_vm12, %v2169_v9, %v2161_v7  ;;  %v1636_v11 = vsel %vm916_vm5, 1.0, %v1887_v0  ;;  %vm945_vm8 = vmand %vm2152_vm3, %vm831_vm6  ;;  %v800_v29 = vrot.slane %v2169_v9, %v2146_v3 }
 0x154   : > { %v1197_v12 = vsel %vm2499_vm13, %v1196_v10, %v2166_v8  ;;  %v923_v13 = vrot.slane %v1636_v11, %v2146_v3  ;;  %vm983_vm10 = vmand %vm2152_vm3, %vm872_vm7 }
 0x155   : > { %vm984_vm13 = vmand %vm983_vm10, %vm874_vm11  ;;  %vm811_vm10 = vcmask 130048  }
 0x156   : > { %v2185_v14 = vsel %vm2498_vm14, %v1197_v12, %v923_v13  ;;  %vm946_vm14 = vmand %vm945_vm8, %vm833_vm9  ;;  %v1638_v25 = vsel %vm984_vm13, 1.0, %v1887_v0  ;;  %v1760_v33 = vpack.i.bf16 %v923_v13, %v800_v29  ;;  %vm1174_vm13 = vcmask 1046528  }
 0x157   : > { %v1637_v24 = vsel %vm946_vm14, 1.0, %v1887_v0  ;;  %v991_v27 = vrot.slane %v1638_v25, %v2146_v3  ;;  %vm777_vm14 = vcmask 138240   ;;  %vm769_vm8 = vcmask 1047688  }
 0x158   : > { %v953_v26 = vrot.slane %v1637_v24, %v2146_v3 }
 0x15a   : > { %v1765_v32 = vpack.i.bf16 %v991_v27, %v953_v26 }
 0x21b   : > { %v647_v47 = vpop.f32.mrb[0].mxu1 }
 0x21c   : > { %v648_v48 = vadd.f32 %v647_v47, %v559_v46  ;;  %v649_v49 = vpop.f32.mrb[1].mxu1 }
 0x21d   : > { %v650_v50 = vadd.f32 %v649_v49, %v559_v46  ;;  %v555_v46 = vld [vmem:[%s2489_s4 + $0x10] sm:$0xff] }
 0x21e   : > { %v2095_v51 = vmul.f32 0.35355338, %v648_v48 }
 0x21f   : > { %v2097_v52 = vmul.f32 0.35355338, %v650_v50  ;;  %v653_v53 = vpop.f32.mrb[2].mxu1 }
 0x220   : > { %670 = vrot.lane.b32.xlu1 %v2095_v51, %s1889_s26  ;;  %v2101_v54 = vpop.f32.mrb[3].mxu1 }
 0x221   : > { %672 = vrot.lane.b32.xlu0 %v2097_v52, %s1889_s26 }
 0x223   : > { %v2280_v39 = vpop.f32.mrb[4].mxu1 }
 0x224   : > { %563 = vperm.xlu1 %1754, %v554_v55   ;;  %v2282_v40 = vpop.f32.mrb[5].mxu1 }
 0x292   : > { %v671_v15 = vpop.permute.xlu1 %670 }
 0x293   : > { %v673_v16 = vpop.permute.xlu0 %672 }
 0x294   : > { %v675_v17 = vsel %vm2500_vm15, %v671_v15, %v673_v16 }
 0x295   : > { %1650 = vmatprep.subr.mxu1 %v675_v17 }
 0x296   : > { %1651 = vmatpush3.msra.mxu1 %v675_v17 }
 0x297   : > { %1653 = vmatmul.mubr.msk.f32.vlgmr.msra.gmra.mrb[6].mxu1 %vm418_vm1, %v667_v18  ;;  %vm1022_vm1 = vcmp.ge.s32.totalorder %v1021_v22, 0 }
 0x298   : > { %vm2221_vm5 = vmand %vm1022_vm1, %vm1023_vm4 }
 0x299   : > { %vm1025_vm3 = vmand %vm2221_vm5, %vm790_vm0 }
 0x29a   : > { %vm1063_vm1 = vmand %vm2221_vm5, %vm831_vm6 }
 0x29b   : > { %vm1026_vm4 = vmand %vm1025_vm3, %vm792_vm2  ;;  %vm1171_vm2 = vcmask 1045504   ;;  %vm892_vm3 = vcmask 7168  }
 0x29c   : > { %vm1064_vm0 = vmand %vm1063_vm1, %vm833_vm9  ;;  %v1639_v30 = vsel %vm1026_vm4, 1.0, %v1887_v0  ;;  %vm963_vm1 = vcmask 1039360   ;;  %vm1001_vm4 = vcmask 924672  }
 0x29d   : > { %vm1100_vm6 = vmand %vm2221_vm5, %vm872_vm7  ;;  %v1640_v31 = vsel %vm1064_vm0, 1.0, %v1887_v0  ;;  %v1033_v34 = vrot.slane %v1639_v30, %v2146_v3  ;;  %vm1165_vm7 = vcmask 1043456   ;;  %vm851_vm5 = vcmask 121856  }
 0x29e   : > { %vm1101_vm9 = vmand %vm1100_vm6, %vm874_vm11  ;;  %v1071_v35 = vrot.slane %v1640_v31, %v2146_v3  ;;  %v1199_v41 = vsel %vm1165_vm7, %v2185_v14, %v953_v26  ;;  %vm1168_vm11 = vcmask 1044480   ;;  %vm1043_vm0 = vcmask 916480  }
 0x29f   : > { %v1641_v36 = vsel %vm1101_vm9, 1.0, %v1887_v0  ;;  %v1200_v0 = vsel %vm1168_vm11, %v1199_v41, %v991_v27  ;;  %vm2514_vm6 = vcmask 1041408  }
 0x2a0   : > { %v1770_v37 = vpack.i.bf16 %v1071_v35, %v1033_v34  ;;  %v1108_v38 = vrot.slane %v1641_v36, %v2146_v3  ;;  %v1201_v43 = vsel %vm1171_vm2, %v1200_v0, %v1033_v34  ;;  %vm2515_vm9 = vmmov %vm2514_vm6 }
 0x2a1   : > { %v1202_v45 = vsel %vm1174_vm13, %v1201_v43, %v1071_v35 }
 0x2a3   : > { %v564_v19 = vpop.permute.xlu1 %563 }
 0x2a4   : > { %v2192_v20 = vadd.f32 %v653_v53, %v564_v19  ;;  %v2203_v21 = vadd.f32 %v2101_v54, %v564_v19 }
 0x2a6   : > { %959 = vrot.lane.b32.xlu1 %v2192_v20, %s1890_s23  ;;  %807 = vrot.lane.b32.xlu0 %v2192_v20, %s1891_s20  ;;  %v930_v55 = vmul.f32 %v2097_v52, %v2203_v21  ;;  %v929_v56 = vmul.f32 %v2095_v51, %v2192_v20 }
 0x2a8   : > { %v938_v58 = vsel %vm777_vm14, %v930_v55, 0.0  ;;  %v931_v62 = vsel %vm769_vm8, %v929_v56, 0.0 }
 0x2a9   : > { %v939_v63 = vrot.slane %v938_v58, 4  ;;  %v932_v6 = vrot.slane %v931_v62, 4 }
 0x2aa   : > { %997 = vrot.lane.b32.xlu1 %v2192_v20, %s1892_s22  ;;  %847 = vrot.lane.b32.xlu0 %v2192_v20, %s1893_s25 }
 0x2ab   : > { %v940_v10 = vadd.f32 %v939_v63, %v938_v58  ;;  %v933_v15 = vadd.f32 %v932_v6, %v931_v62 }
 0x2ad   : > { %v941_v19 = vrot.slane %v940_v10, 2  ;;  %v934_v26 = vrot.slane %v933_v15, 2 }
 0x2ae   : > { %809 = vrot.lane.b32.xlu1 %v2203_v21, %s1891_s20  ;;  %888 = vrot.lane.b32.xlu0 %v2192_v20, %s1894_s14 }
 0x2af   : > { %v935_v0 = vadd.f32 %v934_v26, %v933_v15 }
 0x2b2   : > { %849 = vrot.lane.b32.xlu1 %v2203_v21, %s1893_s25  ;;  %764 = vrot.lane.b32.xlu0 %v2192_v20, %s1895_s17 }
 0x2b6   : > { %890 = vrot.lane.b32.xlu1 %v2203_v21, %s1894_s14  ;;  %961 = vrot.lane.b32.xlu0 %v2203_v21, %s1890_s23 }
 0x2ba   : > { %1039 = vrot.lane.b32.xlu1 %v2192_v20, %s1896_s24  ;;  %999 = vrot.lane.b32.xlu0 %v2203_v21, %s1892_s22 }
 0x2be   : > { %1077 = vrot.lane.b32.xlu1 %v2192_v20, %s1889_s26  ;;  %1041 = vrot.lane.b32.xlu0 %v2203_v21, %s1896_s24 }
 0x2c2   : > { %1756 = vrot.lane.b32.xlu1 %v1755_v28, %s1895_s17  ;;  %1079 = vrot.lane.b32.xlu0 %v2203_v21, %s1889_s26 }
 0x2c6   : > { %1766 = vrot.lane.b32.xlu1 %v1765_v32, %s1895_s17  ;;  %1761 = vrot.lane.b32.xlu0 %v1760_v33, %s1895_s17 }
 0x2ca   : > { %1771 = vrot.lane.b32.xlu0 %v1770_v37, %s1895_s17  ;;  %1109 = vrot.lane.b32.xlu1 %v1108_v38, %s1895_s17  ;;  %v942_v37 = vadd.f32 %v941_v19, %v940_v10 }
 0x318   : > { %v808_v47 = vpop.permute.xlu0 %807  ;;  %v960_v48 = vpop.permute.xlu1 %959 }
 0x319   : > { %v815_v57 = vmul.f32 %v808_v47, %v2095_v51 }
 0x31b   : > { %v817_v2 = vsel %vm769_vm8, %v815_v57, 0.0  ;;  %v943_v57 = vrot.slane %v942_v37, 1 }
 0x31c   : > { %v848_v49 = vpop.permute.xlu0 %847  ;;  %v998_v50 = vpop.permute.xlu1 %997  ;;  %v818_v7 = vrot.slane %v817_v2, 4 }
 0x31d   : > { %v855_v4 = vmul.f32 %v848_v49, %v2095_v51 }
 0x31e   : > { %v819_v17 = vadd.f32 %v818_v7, %v817_v2 }
 0x31f   : > { %v857_v13 = vsel %vm769_vm8, %v855_v4, 0.0 }
 0x320   : > { %v889_v53 = vpop.permute.xlu0 %888  ;;  %v810_v54 = vpop.permute.xlu1 %809  ;;  %v858_v20 = vrot.slane %v857_v13, 4  ;;  %v820_v29 = vrot.slane %v819_v17, 2 }
 0x321   : > { %v812_v60 = vsel %vm811_vm10, %v808_v47, %v810_v54  ;;  %v896_v11 = vmul.f32 %v889_v53, %v2095_v51 }
 0x322   : > { %v816_v5 = vmul.f32 %v812_v60, %v2097_v52  ;;  %v859_v33 = vadd.f32 %v858_v20, %v857_v13 }
 0x323   : > { %v898_v22 = vsel %vm769_vm8, %v896_v11, 0.0 }
 0x324   : > { %v765_v59 = vpop.permute.xlu0 %764  ;;  %v850_v61 = vpop.permute.xlu1 %849  ;;  %v824_v14 = vsel %vm777_vm14, %v816_v5, 0.0  ;;  %v899_v30 = vrot.slane %v898_v22, 4  ;;  %v860_v54 = vrot.slane %v859_v33, 2 }
 0x325   : > { %v852_v8 = vsel %vm851_vm5, %v848_v49, %v850_v61  ;;  %v825_v21 = vrot.slane %v824_v14, 4  ;;  %v767_v23 = vmul.f32 %v765_v59, %v2095_v51  ;;  %v768_v24 = vmul.f32 %v765_v59, %v2097_v52 }
 0x326   : > { %v856_v16 = vmul.f32 %v852_v8, %v2097_v52  ;;  %v900_v47 = vadd.f32 %v899_v30, %v898_v22  ;;  %v936_v61 = vrot.slane %v935_v0, 1 }
 0x327   : > { %v826_v34 = vadd.f32 %v825_v21, %v824_v14  ;;  %v770_v35 = vsel %vm769_vm8, %v767_v23, 0.0  ;;  %v778_v41 = vsel %vm777_vm14, %v768_v24, 0.0 }
 0x328   : > { %v962_v9 = vpop.permute.xlu0 %961  ;;  %v891_v12 = vpop.permute.xlu1 %890  ;;  %v864_v27 = vsel %vm777_vm14, %v856_v16, 0.0  ;;  %v779_v56 = vrot.slane %v778_v41, 4  ;;  %v901_v5 = vrot.slane %v900_v47, 2  ;;  %v2336_v21 = vadd.f32 %v936_v61, %v935_v0 }
 0x329   : > { %v893_v18 = vsel %vm892_vm3, %v889_v53, %v891_v12  ;;  %v964_v31 = vsel %vm963_vm1, %v960_v48, %v962_v9  ;;  %v968_v32 = vmul.f32 %v962_v9, %v2097_v52  ;;  %v865_v38 = vrot.slane %v864_v27, 4 }
 0x32a   : > { %v897_v28 = vmul.f32 %v893_v18, %v2097_v52  ;;  %v967_v43 = vmul.f32 %v964_v31, %v2095_v51  ;;  %v771_v48 = vrot.slane %v770_v35, 4  ;;  %v827_v55 = vrot.slane %v826_v34, 2 }
 0x32b   : > { %v976_v49 = vsel %vm777_vm14, %v968_v32, 0.0  ;;  %v866_v58 = vadd.f32 %v865_v38, %v864_v27  ;;  %v861_v9 = vadd.f32 %v860_v54, %v859_v33  ;;  %v780_v10 = vadd.f32 %v779_v56, %v778_v41 }
 0x32c   : > { %v1000_v25 = vpop.permute.xlu0 %999  ;;  %v969_v62 = vsel %vm769_vm8, %v967_v43, 0.0  ;;  %v772_v6 = vadd.f32 %v771_v48, %v770_v35  ;;  %v828_v11 = vadd.f32 %v827_v55, %v826_v34  ;;  %v2332_v12 = vadd.f32 %v943_v57, %v942_v37 }
 0x32d   : > { %v970_v13 = vrot.slane %v969_v62, 4  ;;  %v867_v18 = vrot.slane %v866_v58, 2  ;;  %v902_v22 = vadd.f32 %v901_v5, %v900_v47  ;;  %v781_v26 = vrot.slane %v780_v10, 2 }
 0x32e   : > { %v773_v23 = vrot.slane %v772_v6, 2  ;;  %v829_v34 = vrot.slane %v828_v11, 1 }
 0x32f   : > { %v971_v31 = vadd.f32 %v970_v13, %v969_v62  ;;  %v868_v38 = vadd.f32 %v867_v18, %v866_v58 }
 0x330   : > { %v1042_v53 = vpop.permute.xlu0 %1041  ;;  %v774_v41 = vadd.f32 %v773_v23, %v772_v6  ;;  %v830_v54 = vadd.f32 %v829_v34, %v828_v11  ;;  %v903_v6 = vrot.slane %v902_v22, 1 }
 0x331   : > { %v1048_v7 = vmul.f32 %v1042_v53, %v2097_v52  ;;  %v972_v48 = vrot.slane %v971_v31, 2  ;;  %v869_v57 = vrot.slane %v868_v38, 1 }
 0x332   : > { %v775_v62 = vrot.slane %v774_v41, 1 }
 0x333   : > { %v1056_v24 = vsel %vm777_vm14, %v1048_v7, 0.0 }
 0x334   : > { %v1057_v37 = vrot.slane %v1056_v24, 4 }
 0x336   : > { %v1058_v56 = vadd.f32 %v1057_v37, %v1056_v24 }
 0x36a   : > { %v1654_v42 = vpop.f32.mrb[6].mxu1 }
 0x36b   : > { %v749_v44 = vpop.f32.mrb[7].mxu1  ;;  %1181 = vrot.lane.b32.xlu1 %v1654_v42, %s1895_s17  ;;  %v905_v42 = vsel %vm777_vm14, %v897_v28, 0.0 }
 0x36c   : > { %1179 = vrot.lane.b32.xlu0 %v749_v44, %s1895_s17  ;;  %v1002_v44 = vsel %vm1001_vm4, %v998_v50, %v1000_v25  ;;  %v906_v59 = vrot.slane %v905_v42, 4  ;;  %v977_v50 = vrot.slane %v976_v49, 4 }
 0x36d   : > { %v1005_v60 = vmul.f32 %v1002_v44, %v2095_v51  ;;  %v782_v44 = vadd.f32 %v781_v26, %v780_v10  ;;  %v904_v26 = vadd.f32 %v903_v6, %v902_v22 }
 0x36e   : > { %v907_v19 = vadd.f32 %v906_v59, %v905_v42  ;;  %v978_v20 = vadd.f32 %v977_v50, %v976_v49 }
 0x36f   : > { %1268 = vrot.lane.b32.xlu1 %v1641_v36, %s1895_s17  ;;  %v1040_v36 = vpop.permute.xlu1 %1039  ;;  %v1007_v14 = vsel %vm769_vm8, %v1005_v60, 0.0 }
 0x370   : > { %1266 = vrot.lane.b32.xlu0 %v1202_v45, %s1895_s17  ;;  %v1006_v45 = vmul.f32 %v1000_v25, %v2097_v52  ;;  %v1044_v4 = vsel %vm1043_vm0, %v1040_v36, %v1042_v53  ;;  %v1008_v27 = vrot.slane %v1007_v14, 4  ;;  %v908_v35 = vrot.slane %v907_v19, 2 }
 0x371   : > { %v1047_v16 = vmul.f32 %v1044_v4, %v2095_v51  ;;  %v979_v36 = vrot.slane %v978_v20, 2 }
 0x372   : > { %v1014_v63 = vsel %vm777_vm14, %v1006_v45, 0.0  ;;  %v1009_v45 = vadd.f32 %v1008_v27, %v1007_v14  ;;  %v909_v59 = vadd.f32 %v908_v35, %v907_v19  ;;  %v1059_v14 = vrot.slane %v1058_v56, 2 }
 0x373   : > { %v1078_v2 = vpop.permute.xlu1 %1077  ;;  %v1015_v15 = vrot.slane %v1014_v63, 4  ;;  %v1049_v33 = vsel %vm769_vm8, %v1047_v16, 0.0  ;;  %v980_v55 = vadd.f32 %v979_v36, %v978_v20  ;;  %v776_v16 = vadd.f32 %v775_v62, %v774_v41 }
 0x374   : > { %568 = vperm.xlu0 %1753, %v555_v46   ;;  %v821_v46 = vadd.f32 %v820_v29, %v819_v17  ;;  %v1080_v17 = vpop.permute.xlu0 %1079  ;;  %v862_v29 = vrot.slane %v861_v9, 1  ;;  %v910_v13 = vrot.slane %v909_v59, 1  ;;  %v1060_v37 = vadd.f32 %v1059_v14, %v1058_v56 }
 0x375   : > { %v1081_v30 = vsel %vm2500_vm15, %v1078_v2, %v1080_v17  ;;  %v1016_v32 = vadd.f32 %v1015_v15, %v1014_v63  ;;  %v1085_v43 = vmul.f32 %v1080_v17, %v2097_v52  ;;  %v1010_v52 = vrot.slane %v1009_v45, 2 }
 0x376   : > { %v822_v8 = vrot.slane %v821_v46, 1  ;;  %v1084_v42 = vmul.f32 %v1081_v30, %v2095_v51  ;;  %v863_v47 = vadd.f32 %v862_v29, %v861_v9  ;;  %v783_v2 = vrot.slane %v782_v44, 1 }
 0x377   : > { %v1757_v28 = vpop.permute.xlu1 %1756  ;;  %v1017_v49 = vrot.slane %v1016_v32, 2  ;;  %v1093_v51 = vsel %vm777_vm14, %v1085_v43, 0.0  ;;  %v911_v30 = vadd.f32 %v910_v13, %v909_v59  ;;  %v981_v34 = vrot.slane %v980_v55, 1 }
 0x378   : > { %v823_v25 = vadd.f32 %v822_v8, %v821_v46  ;;  %v1758_v0 = vunpack.i.l.bf16 %v1757_v28  ;;  %v1050_v46 = vrot.slane %v1049_v33, 4  ;;  %v1759_v53 = vunpack.i.h.bf16 %v1757_v28  ;;  %v1762_v60 = vpop.permute.xlu0 %1761 }
 0x379   : > { %v1086_v61 = vsel %vm769_vm8, %v1084_v42, 0.0  ;;  %v1018_v4 = vadd.f32 %v1017_v49, %v1016_v32  ;;  %v1763_v7 = vunpack.i.l.bf16 %v1762_v60  ;;  %v870_v8 = vadd.f32 %v869_v57, %v868_v38 }
 0x37a   : > { %v845_v58 = vmul.f32 %v1758_v0, %v823_v25  ;;  %v1051_v50 = vadd.f32 %v1050_v46, %v1049_v33  ;;  %v846_v63 = vmul.f32 %v1758_v0, %v830_v54  ;;  %v886_v5 = vmul.f32 %v1759_v53, %v863_v47 }
 0x37b   : > { %v1087_v9 = vrot.slane %v1086_v61, 4  ;;  %v1094_v10 = vrot.slane %v1093_v51, 4  ;;  %v1767_v11 = vpop.permute.xlu1 %1766  ;;  %v1764_v17 = vunpack.i.h.bf16 %v1762_v60  ;;  %v887_v19 = vmul.f32 %v1759_v53, %v870_v8 }
 0x37c   : > { %v1116_v15 = vrot.slane %v845_v58, 7  ;;  %v1052_v18 = vrot.slane %v1051_v50, 2  ;;  %v1117_v20 = vrot.slane %v846_v63, 7  ;;  %v784_v23 = vadd.f32 %v783_v2, %v782_v44 }
 0x37d   : > { %v1768_v24 = vunpack.i.l.bf16 %v1767_v11  ;;  %v973_v25 = vadd.f32 %v972_v48, %v971_v31  ;;  %v804_v27 = vmul.f32 %v1763_v7, %v776_v16  ;;  %v1088_v28 = vadd.f32 %v1087_v9, %v1086_v61  ;;  %v1772_v48 = vpop.permute.xlu0 %1771 }
 0x37e   : > { %v1095_v29 = vadd.f32 %v1094_v10, %v1093_v51  ;;  %v805_v32 = vmul.f32 %v1763_v7, %v784_v23  ;;  %v1122_v33 = vrot.slane %v886_v5, 6  ;;  %v927_v35 = vmul.f32 %v1764_v17, %v904_v26 }
 0x37f   : > { %v1011_v36 = vadd.f32 %v1010_v52, %v1009_v45  ;;  %v1769_v38 = vunpack.i.h.bf16 %v1767_v11  ;;  %v928_v41 = vmul.f32 %v1764_v17, %v911_v30  ;;  %v1053_v0 = vadd.f32 %v1052_v18, %v1051_v50 }
 0x380   : > { %v1123_v42 = vrot.slane %v887_v19, 6  ;;  %v957_v43 = vmul.f32 %v1768_v24, %v2336_v21  ;;  %v974_v44 = vrot.slane %v973_v25, 1  ;;  %v1157_v31 = vsel %vm1156_vm12, %v804_v27, %v1116_v15 }
 0x381   : > { %v1096_v22 = vrot.slane %v1095_v29, 2  ;;  %v958_v46 = vmul.f32 %v1768_v24, %v2332_v12  ;;  %v1158_v47 = vsel %vm1156_vm12, %v805_v32, %v1117_v20  ;;  %v1089_v49 = vrot.slane %v1088_v28, 2 }
 0x382   : > { %v982_v53 = vadd.f32 %v981_v34, %v980_v55  ;;  %v1128_v54 = vrot.slane %v927_v35, 5  ;;  %v1012_v45 = vrot.slane %v1011_v36, 1  ;;  %v1019_v56 = vrot.slane %v1018_v4, 1 }
 0x383   : > { %v1129_v57 = vrot.slane %v928_v41, 5  ;;  %v1160_v59 = vsel %vm2514_vm6, %v1157_v31, %v1122_v33  ;;  %v1054_v60 = vrot.slane %v1053_v0, 1  ;;  %v1061_v58 = vrot.slane %v1060_v37, 1 }
 0x384   : > { %v975_v21 = vadd.f32 %v974_v44, %v973_v25  ;;  %v1134_v61 = vrot.slane %v957_v43, 4  ;;  %v1161_v51 = vsel %vm2515_vm9, %v1158_v47, %v1123_v42  ;;  %v1773_v62 = vunpack.i.l.bf16 %v1772_v48 }
 0x385   : > { %v996_v52 = vmul.f32 %v1769_v38, %v982_v53  ;;  %v1135_v12 = vrot.slane %v958_v46, 4  ;;  %v1090_v50 = vadd.f32 %v1089_v49, %v1088_v28  ;;  %v1097_v63 = vadd.f32 %v1096_v22, %v1095_v29  ;;  %v1110_v29 = vpop.permute.xlu1 %1109 }
 0x386   : > { %v995_v2 = vmul.f32 %v1769_v38, %v975_v21  ;;  %vm2516_vm12 = vcmask 1042432   ;;  %v1013_v5 = vadd.f32 %v1012_v45, %v1011_v36  ;;  %v1020_v6 = vadd.f32 %v1019_v56, %v1018_v4 }
 0x387   : > { %v1163_v55 = vsel %vm2516_vm12, %v1160_v59, %v1128_v54  ;;  %vm2517_vm15 = vmmov %vm2516_vm12  ;;  %v1055_v8 = vadd.f32 %v1054_v60, %v1053_v0  ;;  %v1062_v9 = vadd.f32 %v1061_v58, %v1060_v37  ;;  %v1774_v10 = vunpack.i.h.bf16 %v1772_v48 }
 0x388   : > { %v1164_v7 = vsel %vm2517_vm15, %v1161_v51, %v1129_v57  ;;  %v1037_v11 = vmul.f32 %v1773_v62, %v1013_v5  ;;  %v1038_v13 = vmul.f32 %v1773_v62, %v1020_v6  ;;  %v1091_v14 = vrot.slane %v1090_v50, 1 }
 0x389   : > { %v1098_v15 = vrot.slane %v1097_v63, 1  ;;  %v1166_v16 = vsel %vm1165_vm7, %v1163_v55, %v1134_v61  ;;  %v1167_v17 = vsel %vm1165_vm7, %v1164_v7, %v1135_v12  ;;  %v1140_v18 = vrot.slane %v995_v2, 3 }
 0x38a   : > { %v1141_v19 = vrot.slane %v996_v52, 3  ;;  %v1075_v20 = vmul.f32 %v1774_v10, %v1055_v8  ;;  %v1076_v23 = vmul.f32 %v1774_v10, %v1062_v9  ;;  %v1146_v24 = vrot.slane %v1037_v11, 2 }
 0x38b   : > { %v1147_v25 = vrot.slane %v1038_v13, 2  ;;  %v1092_v4 = vadd.f32 %v1091_v14, %v1090_v50  ;;  %v1099_v26 = vadd.f32 %v1098_v15, %v1097_v63  ;;  %v1169_v27 = vsel %vm1168_vm11, %v1166_v16, %v1140_v18 }
 0x38c   : > { %v1170_v28 = vsel %vm1168_vm11, %v1167_v17, %v1141_v19  ;;  %v1152_v30 = vrot.slane %v1075_v20, 1  ;;  %v1153_v32 = vrot.slane %v1076_v23, 1  ;;  %v1172_v33 = vsel %vm1171_vm2, %v1169_v27, %v1146_v24 }
 0x38d   : > { %v1173_v34 = vsel %vm1171_vm2, %v1170_v28, %v1147_v25  ;;  %v1112_v35 = vmul.f32 %v1110_v29, %v1092_v4  ;;  %v1113_v36 = vmul.f32 %v1110_v29, %v1099_v26  ;;  %vm1204_vm15 = vcmask 1040520  }
 0x38e   : > { %vm1214_vm7 = vcmask 131072   ;;  %v1175_v42 = vsel %vm1174_vm13, %v1172_v33, %v1152_v30  ;;  %v1176_v43 = vsel %vm1174_vm13, %v1173_v34, %v1153_v32  ;;  %vm2518_vm11 = vcmask 908288  }
 0x38f   : > { %vm1347_vm2 = vcmask 1031168   ;;  %vm1423_vm13 = vcmask 900096  }
 0x3dd   : > { %v1182_v37 = vpop.permute.xlu1 %1181 }
 0x3de   : > { %v1187_v38 = vadd.f32 %v1182_v37, %v1112_v35  ;;  %v1188_v41 = vadd.f32 %v1182_v37, %v1113_v36  ;;  %v1180_v0 = vpop.permute.xlu0 %1179 }
 0x3df   : > { %v1185_v44 = vadd.f32 %v1180_v0, %v1175_v42  ;;  %v1186_v31 = vadd.f32 %v1180_v0, %v1176_v43 }
 0x3e0   : > { %v1205_v22 = vsel %vm1204_vm15, %v1187_v38, -inf  ;;  %v1215_v46 = vsel %vm1214_vm7, %v1188_v41, -inf }
 0x3e1   : > { %v1203_v47 = vsel %vm769_vm8, %v1185_v44, -inf  ;;  %v1213_v48 = vsel %vm777_vm14, %v1186_v31, -inf }
 0x3e2   : > { %v1206_v49 = vmax.f32 %v1203_v47, %v1205_v22  ;;  %v1216_v53 = vmax.f32 %v1213_v48, %v1215_v46 }
 0x3e4   : > { %v1207_v54 = vrot.slane %v1206_v49, 4  ;;  %v1217_v45 = vrot.slane %v1216_v53, 4 }
 0x3e6   : > { %v1208_v56 = vmax.f32 %v1206_v49, %v1207_v54  ;;  %v1218_v57 = vmax.f32 %v1216_v53, %v1217_v45  ;;  %v1324_v53 = vsub.s32 2, %v2131_v1 }
 0x3e8   : > { %v1209_v59 = vrot.slane %v1208_v56, 2  ;;  %v1219_v60 = vrot.slane %v1218_v57, 2 }
 0x3ea   : > { %v1210_v58 = vmax.f32 %v1208_v56, %v1209_v59  ;;  %v1220_v21 = vmax.f32 %v1218_v57, %v1219_v60  ;;  %v1353_v56 = vsub.s32 3, %v2131_v1  ;;  %v1400_v60 = vsub.s32 5, %v2131_v1 }
 0x3ec   : > { %v1211_v61 = vrot.slane %v1210_v58, 1  ;;  %v1221_v51 = vrot.slane %v1220_v21, 1 }
 0x3ee   : > { %v1212_v62 = vmax.f32 %v1210_v58, %v1211_v61  ;;  %v1222_v52 = vmax.f32 %v1220_v21, %v1221_v51  ;;  %v1429_v61 = vsub.s32 6, %v2131_v1 }
 0x3f0   : > { %v1223_v12 = vsub.f32 %v1185_v44, %v1212_v62  ;;  %v1224_v50 = vsub.f32 %v1186_v31, %v1222_v52  ;;  %v1225_v63 = vsub.f32 %v1187_v38, %v1212_v62  ;;  %v1226_v2 = vsub.f32 %v1188_v41, %v1222_v52  ;;  %v1267_v31 = vpop.permute.xlu0 %1266 }
 0x3f1   : > { %v1296_v44 = vsub.s32 1, %v2131_v1  ;;  %v1458_v52 = vsub.s32 7, %v2131_v1 }
 0x3f2   : > { %v1227_v55 = vmul.f32 1.442695, %v1223_v12  ;;  %v1229_v5 = vmul.f32 1.442695, %v1224_v50  ;;  %v1231_v6 = vmul.f32 1.442695, %v1225_v63  ;;  %v1269_v12 = vpop.permute.xlu1 %1268 }
 0x3f3   : > { %v1233_v7 = vmul.f32 1.442695, %v1226_v2 }
 0x3f4   : > { %1779 = vpow2.f32 %v1227_v55 }
 0x3f5   : > { %1781 = vpow2.f32 %v1229_v5 }
 0x3f6   : > { %1783 = vpow2.f32 %v1231_v6 }
 0x3f7   : > { %1785 = vpow2.f32 %v1233_v7  ;;  %v1381_v7 = vsub.s32 4, %v2131_v1 }
 0x3fe   : > { %v1780_v8 = vpop.eup %1779 }
 0x3ff   : > { %v1782_v9 = vpop.eup %1781  ;;  %v1235_v10 = vsel %vm769_vm8, %v1780_v8, 0.0  ;;  %vm1452_vm8 = vcmask 785408  }
 0x400   : > { %v1784_v11 = vpop.eup %1783  ;;  %v1244_v13 = vsel %vm777_vm14, %v1782_v9, 0.0 }
 0x401   : > { %v1786_v14 = vpop.eup %1785  ;;  %v1236_v15 = vsel %vm1204_vm15, %v1784_v11, 0.0 }
 0x402   : > { %v1237_v16 = vadd.f32 %v1236_v15, %v1235_v10  ;;  %v1245_v17 = vsel %vm1214_vm7, %v1786_v14, 0.0 }
 0x403   : > { %v1246_v18 = vadd.f32 %v1245_v17, %v1244_v13 }
 0x404   : > { %v1238_v19 = vrot.slane %v1237_v16, 4 }
 0x405   : > { %v1247_v20 = vrot.slane %v1246_v18, 4 }
 0x406   : > { %v1239_v23 = vadd.f32 %v1238_v19, %v1237_v16 }
 0x407   : > { %v1248_v24 = vadd.f32 %v1247_v20, %v1246_v18 }
 0x408   : > { %v1240_v25 = vrot.slane %v1239_v23, 2 }
 0x409   : > { %v1249_v4 = vrot.slane %v1248_v24, 2 }
 0x40a   : > { %v1241_v26 = vadd.f32 %v1240_v25, %v1239_v23 }
 0x40b   : > { %v1250_v27 = vadd.f32 %v1249_v4, %v1248_v24 }
 0x40c   : > { %v1242_v28 = vrot.slane %v1241_v26, 1 }
 0x40d   : > { %v1251_v29 = vrot.slane %v1250_v27, 1 }
 0x40e   : > { %v1243_v30 = vadd.f32 %v1242_v28, %v1241_v26 }
 0x40f   : > { %v1252_v32 = vadd.f32 %v1251_v29, %v1250_v27 }
 0x410   : > { %1787 = vrcp.f32 %v1243_v30 }
 0x411   : > { %1789 = vrcp.f32 %v1252_v32 }
 0x41a   : > { %v1788_v33 = vpop.eup %1787 }
 0x41b   : > { %v1790_v34 = vpop.eup %1789  ;;  %v1255_v35 = vmul.f32 %v1788_v33, %v1243_v30 }
 0x41c   : > { %v1256_v36 = vmul.f32 %v1790_v34, %v1252_v32 }
 0x41d   : > { %v1257_v37 = vsub.f32 2.0, %v1255_v35 }
 0x41e   : > { %v1258_v38 = vsub.f32 2.0, %v1256_v36 }
 0x41f   : > { %v1259_v41 = vmul.f32 %v1788_v33, %v1257_v37 }
 0x420   : > { %v1260_v0 = vmul.f32 %v1790_v34, %v1258_v38 }
 0x421   : > { %v1261_v42 = vmul.f32 %v1780_v8, %v1259_v41  ;;  %v1263_v43 = vmul.f32 %v1784_v11, %v1259_v41 }
 0x422   : > { %v1262_v22 = vmul.f32 %v1782_v9, %v1260_v0  ;;  %v1264_v46 = vmul.f32 %v1786_v14, %v1260_v0  ;;  %v569_v9 = vpop.permute.xlu0 %568 }
 0x423   : > { %v1272_v47 = vmul.f32 %v1267_v31, %v1261_v42  ;;  %v1274_v63 = vmul.f32 %v1269_v12, %v1263_v43  ;;  %v2395_v15 = vadd.f32 %v2280_v39, %v569_v9  ;;  %v662_v1 = vadd.f32 %v2282_v40, %v569_v9 }
 0x424   : > { %v1273_v48 = vmul.f32 %v1267_v31, %v1262_v22  ;;  %v1275_v55 = vmul.f32 %v1269_v12, %v1264_v46 }
 0x425   : > { %v1297_v49 = vrot.slane %v1272_v47, %v1296_v44  ;;  %v1325_v45 = vrot.slane %v1272_v47, %v1324_v53  ;;  %v1354_v59 = vrot.slane %v1272_v47, %v1353_v56  ;;  %v1401_v21 = vrot.slane %v1272_v47, %v1400_v60 }
 0x426   : > { %v1301_v54 = vrot.slane %v1273_v48, %v1296_v44  ;;  %v1329_v57 = vrot.slane %v1273_v48, %v1324_v53  ;;  %v1358_v58 = vrot.slane %v1273_v48, %v1353_v56  ;;  %v1405_v51 = vrot.slane %v1273_v48, %v1400_v60 }
 0x427   : > { %1304 = vrot.lane.b32.xlu1 %v1297_v49, %s1896_s24  ;;  %v1430_v62 = vrot.slane %v1272_v47, %v1429_v61  ;;  %v1434_v50 = vrot.slane %v1273_v48, %v1429_v61  ;;  %v1459_v2 = vrot.slane %v1272_v47, %v1458_v52  ;;  %v1463_v5 = vrot.slane %v1273_v48, %v1458_v52 }
 0x428   : > { %1306 = vrot.lane.b32.xlu0 %v1301_v54, %s1896_s24  ;;  %v1488_v6 = vrot.slane %v1274_v63, %v2146_v3  ;;  %v1492_v8 = vrot.slane %v1275_v55, %v2146_v3  ;;  %v1279_v10 = vrot.slane %v1272_v47, %v2146_v3  ;;  %v1382_v11 = vrot.slane %v1272_v47, %v1381_v7 }
 0x429   : > { %v1283_v13 = vrot.slane %v1273_v48, %v2146_v3  ;;  %v1386_v14 = vrot.slane %v1273_v48, %v1381_v7 }
 0x42a   : > { %v1387_v16 = vmul.f32 %v1382_v11, %v2395_v15 }
 0x42b   : > { %1332 = vrot.lane.b32.xlu1 %v1325_v45, %s1892_s22  ;;  %v1388_v17 = vmul.f32 %v1386_v14, %v662_v1 }
 0x42c   : > { %1334 = vrot.lane.b32.xlu0 %v1329_v57, %s1892_s22  ;;  %s1643_s22 = sshll.u32 %s1873_s9, 1 }
 0x42f   : > { %1361 = vrot.lane.b32.xlu1 %v1354_v59, %s1890_s23 }
 0x430   : > { %1363 = vrot.lane.b32.xlu0 %v1358_v58, %s1890_s23 }
 0x433   : > { %1408 = vrot.lane.b32.xlu1 %v1401_v21, %s1894_s14 }
 0x434   : > { %1410 = vrot.lane.b32.xlu0 %v1405_v51, %s1894_s14 }
 0x437   : > { %1437 = vrot.lane.b32.xlu1 %v1430_v62, %s1893_s25 }
 0x438   : > { %1439 = vrot.lane.b32.xlu0 %v1434_v50, %s1893_s25  ;;  %s1527_s25 = sadd.s32 %s1869_s30, %s1643_s22 }
 0x439   : > { %s1644_s14 = sshll.u32 %s1527_s25, 7 }
 0x43a   : > { %s2432_s21 = scalar_lea.hbm %s2493_s8, %s1644_s14 }
 0x43b   : > { %1466 = vrot.lane.b32.xlu1 %v1459_v2, %s1891_s20 }
 0x43c   : > { %1468 = vrot.lane.b32.xlu0 %v1463_v5, %s1891_s20 }
 0x43f   : > { %1495 = vrot.lane.b32.xlu1 %v1488_v6, %s1895_s17 }
 0x440   : > { %1497 = vrot.lane.b32.xlu0 %v1492_v8, %s1895_s17 }
 0x443   : > { %1286 = vrot.lane.b32.xlu1 %v1279_v10, %s1889_s26 }
 0x444   : > { %1288 = vrot.lane.b32.xlu0 %v1283_v13, %s1889_s26 }
 0x447   : > { %1391 = vrot.lane.b32.xlu1 %v1387_v16, %s1889_s26 }
 0x448   : > { %1393 = vrot.lane.b32.xlu0 %v1388_v17, %s1889_s26  ;;  %s1898_s26 = smov 110  }
 0x499   : > { %v1305_v18 = vpop.permute.xlu1 %1304 }
 0x49a   : > { %v1307_v19 = vpop.permute.xlu0 %1306 }
 0x49b   : > { %v1312_v3 = vmul.f32 %v1307_v19, %v662_v1  ;;  %v1308_v28 = vsel %vm1043_vm0, %v1305_v18, %v1307_v19 }
 0x49c   : > { %v1311_v33 = vmul.f32 %v1308_v28, %v2395_v15 }
 0x49d   : > { %1317 = vrot.lane.b32.xlu0 %v1312_v3, %s1890_s23  ;;  %v1333_v39 = vpop.permute.xlu1 %1332 }
 0x49e   : > { %v1335_v20 = vpop.permute.xlu0 %1334 }
 0x49f   : > { %v1340_v23 = vmul.f32 %v1335_v20, %v662_v1  ;;  %v1336_v35 = vsel %vm1001_vm4, %v1333_v39, %v1335_v20 }
 0x4a0   : > { %v1339_v41 = vmul.f32 %v1336_v35, %v2395_v15 }
 0x4a1   : > { %1345 = vrot.lane.b32.xlu0 %v1340_v23, %s1897_s11  ;;  %v1362_v40 = vpop.permute.xlu1 %1361 }
 0x4a2   : > { %v1364_v24 = vpop.permute.xlu0 %1363 }
 0x4a3   : > { %v1369_v25 = vmul.f32 %v1364_v24, %v662_v1  ;;  %v1365_v42 = vsel %vm963_vm1, %v1362_v40, %v1364_v24 }
 0x4a4   : > { %v1368_v22 = vmul.f32 %v1365_v42, %v2395_v15 }
 0x4a5   : > { %1374 = vrot.lane.b32.xlu0 %v1369_v25, %s1896_s24  ;;  %v1409_v4 = vpop.permute.xlu1 %1408 }
 0x4a6   : > { %v1411_v26 = vpop.permute.xlu0 %1410  ;;  %v1415_v27 = vmul.f32 %v1409_v4, %v2395_v15 }
 0x4a7   : > { %v1412_v29 = vsel %vm892_vm3, %v1409_v4, %v1411_v26 }
 0x4a8   : > { %v1416_v30 = vmul.f32 %v1412_v29, %v662_v1  ;;  %1419 = vrot.lane.b32.xlu1 %v1415_v27, %s1898_s26 }
 0x4a9   : > { %v1438_v32 = vpop.permute.xlu1 %1437 }
 0x4aa   : > { %v1440_v34 = vpop.permute.xlu0 %1439  ;;  %1421 = vrot.lane.b32.xlu0 %v1416_v30, %s1898_s26  ;;  %v1444_v49 = vmul.f32 %v1438_v32, %v2395_v15  ;;  %s1902_s26 = smov [#allocation2]  }
 0x4ab   : > { %v1441_v36 = vsel %vm851_vm5, %v1438_v32, %v1440_v34  ;;  %vm1510_vm5 = vcmask 769024  }
 0x4ac   : > { %v1445_v37 = vmul.f32 %v1441_v36, %v662_v1  ;;  %1315 = vrot.lane.b32.xlu1 %v1311_v33, %s1890_s23  ;;  %s320_s23 = sand.u32 1, %s1861_s28  }
 0x4ad   : > { %v1467_v38 = vpop.permute.xlu1 %1466  ;;  %s1617_s20 = sshll.u32 %s320_s23, 3  ;;  %s1516_s30 = scalar_lea.sflag [#allocation3], %s320_s23 }
 0x4ae   : > { %v1469_v0 = vpop.permute.xlu0 %1468  ;;  %1450 = vrot.lane.b32.xlu0 %v1445_v37, %s1899_s10  ;;  %v1473_v53 = vmul.f32 %v1467_v38, %v2395_v15  ;;  %s322_s17 = scalar_lea.vmem [#allocation2], %s1617_s20 }
 0x4af   : > { %v1470_v43 = vsel %vm811_vm10, %v1467_v38, %v1469_v0  ;;  %vm1481_vm10 = vcmask 777216  }
 0x4b0   : > { %v1474_v44 = vmul.f32 %v1470_v43, %v662_v1  ;;  %1343 = vrot.lane.b32.xlu1 %v1339_v41, %s1897_s11 }
 0x4b1   : > { %v1496_v31 = vpop.permute.xlu1 %1495 }
 0x4b2   : > { %v1498_v46 = vpop.permute.xlu0 %1497  ;;  %1479 = vrot.lane.b32.xlu0 %v1474_v44, %s1900_s15  ;;  %v1502_v54 = vmul.f32 %v1496_v31, %v2395_v15 }
 0x4b3   : > { %v1499_v47 = vsel %vm777_vm14, %v1496_v31, %v1498_v46  ;;  %vm2519_vm14 = vmmov %vm2518_vm11 }
 0x4b4   : > { %v1503_v48 = vmul.f32 %v1499_v47, %v662_v1  ;;  %1372 = vrot.lane.b32.xlu1 %v1368_v22, %s1896_s24  ;;  %s1531_s24 = sshll.u32 %s322_s17, 4  ;;  %s2434_s24 = int_to_ptr.vmem [resolvable:$true] %s1531_s24 }
 0x4b5   : > { %v1287_v59 = vpop.permute.xlu1 %1286  ;;  %s1791_s11 = scalar_lea.vmem %s2434_s24, 128 }
 0x4b6   : > { %1508 = vrot.lane.b32.xlu0 %v1503_v48, %s1901_s16  ;;  %v1289_v45 = vpop.permute.xlu0 %1288  ;;  %p1792_p0 = scmp.ne.s32.totalorder %s2434_s24, %s1791_s11 }
 0x4b7   : > { %v1290_v62 = vsel %vm2518_vm11, %v1287_v59, %v1289_v45 }
 0x4b8   : > { %1448 = vrot.lane.b32.xlu1 %v1444_v49, %s1899_s10  ;;  %v1292_v50 = vmul.f32 %v1290_v62, %v2395_v15  ;;  %p1793_p1 = pnand %p1792_p0, %p1999_p3  ;;  %s1795_s10 = sshll.u32 %s1902_s26, 4  ;;  %s1796_s10 = int_to_ptr.vmem [resolvable:$false] %s1795_s10 }
 0x4b9   : > { %v1392_v58 = vpop.permute.xlu1 %1391  ;;  %p1798_p4 = scmp.lt.s32.totalorder %s2434_s24, %s1796_s10 }
 0x4ba   : > { %v1394_v56 = vpop.permute.xlu0 %1393  ;;  %p1794_p2 = pneg %p1793_p1 }
 0x4bb   : > { %v1395_v10 = vsel %vm2519_vm14, %v1392_v58, %v1394_v56 }
 0x4bc   : > { %1477 = vrot.lane.b32.xlu1 %v1473_v53, %s1900_s15  ;;  %s1797_s15 = scalar_lea.vmem %s1796_s10, 256 }
 0x4bd   : > { %p1799_p5 = scmp.lt.s32.totalorder %s1797_s15, %s1791_s11 }
 0x4bf   : > { %p1800_p6 = por %p1799_p5, %p1798_p4 }
 0x4c0   : > { %1506 = vrot.lane.b32.xlu1 %v1502_v54, %s1901_s16 }
 0x4c1   : > { %p1801_p7 = pnand %p1800_p6, %p1794_p2 }
 0x50f   : > { %v1318_v57 = vpop.permute.xlu0 %1317 }
 0x513   : > { %v1346_v60 = vpop.permute.xlu0 %1345 }
 0x517   : > { %v1375_v21 = vpop.permute.xlu0 %1374 }
 0x51a   : > { %v1420_v61 = vpop.permute.xlu1 %1419 }
 0x51c   : > { %v1422_v52 = vpop.permute.xlu0 %1421 }
 0x51d   : > { %v1424_v14 = vsel %vm1423_vm13, %v1420_v61, %v1422_v52 }
 0x51e   : > { %v1316_v51 = vpop.permute.xlu1 %1315 }
 0x51f   : > { %v1319_v12 = vsel %vm963_vm1, %v1316_v51, %v1318_v57 }
 0x520   : > { %v1321_v55 = vadd.f32 %v1319_v12, %v1292_v50  ;;  %v1451_v5 = vpop.permute.xlu0 %1450 }
 0x522   : > { %v1344_v63 = vpop.permute.xlu1 %1343 }
 0x523   : > { %v1348_v2 = vsel %vm1347_vm2, %v1344_v63, %v1346_v60 }
 0x524   : > { %v1350_v6 = vadd.f32 %v1348_v2, %v1321_v55  ;;  %v1480_v15 = vpop.permute.xlu0 %1479 }
 0x526   : > { %v1373_v7 = vpop.permute.xlu1 %1372 }
 0x527   : > { %v1376_v8 = vsel %vm1043_vm0, %v1373_v7, %v1375_v21 }
 0x528   : > { %v1378_v9 = vadd.f32 %v1376_v8, %v1350_v6  ;;  %v1509_v3 = vpop.permute.xlu0 %1508 }
 0x52a   : > { %v1397_v11 = vadd.f32 %v1395_v10, %v1378_v9  ;;  %v1449_v13 = vpop.permute.xlu1 %1448 }
 0x52b   : > { %v1453_v16 = vsel %vm1452_vm8, %v1449_v13, %v1451_v5 }
 0x52c   : > { %v1426_v1 = vadd.f32 %v1424_v14, %v1397_v11 }
 0x52e   : > { %v1455_v17 = vadd.f32 %v1453_v16, %v1426_v1  ;;  %v1478_v18 = vpop.permute.xlu1 %1477 }
 0x52f   : > { %v1482_v19 = vsel %vm1481_vm10, %v1478_v18, %v1480_v15 }
 0x530   : > { %v1484_v39 = vadd.f32 %v1482_v19, %v1455_v17 }
 0x532   : > { %v1507_v20 = vpop.permute.xlu1 %1506 }
 0x533   : > { %v1511_v23 = vsel %vm1510_vm5, %v1507_v20, %v1509_v3 }
 0x534   : > { %v1513_v40 = vadd.f32 %v1511_v23, %v1484_v39 }
 0x536   : > { %1514 = vst [vmem:[%s322_s17] sm:$0xff] %v1513_v40 }
 0x537   : > { %1804 = shalt.err (!%p1801_p7)
}
 0x538   : > { %s1805_s16 = scalar_lea.hbm %s2432_s21, 128  ;;  %s1809_s22 = scalar_lea.hbm %s2493_s8, 512 }
 0x539   : > { %p1806_p9 = scmp.ne.s32.totalorder %s2432_s21, %s1805_s16  ;;  %p1810_p12 = scmp.lt.u32.totalorder %s2432_s21, %s2493_s8 }
 0x53a   : > { %p1811_p13 = scmp.lt.u32.totalorder %s1809_s22, %s1805_s16  ;;  %p1813_p1 = scmp.lt.u32.totalorder %s1805_s16, %s2432_s21 }
 0x53b   : > { %p1807_p10 = pnand %p1806_p9, %p1999_p3 }
 0x53c   : > { %p1812_p0 = por %p1811_p13, %p1810_p12 }
 0x53d   : > { %p1808_p11 = pneg %p1807_p10 }
 0x53e   : > { %p1814_p2 = por %p1813_p1, %p1812_p0 }
 0x540   : > { %p1815_p4 = pnand %p1814_p2, %p1808_p11 }
 0x542   : > { %1818 = shalt.err (!%p1815_p4)
}
 0x543   : > { %1667 = dma.vmem_to_hbm [thread:$0]  (%p1999_p3), %s2434_s24, 128, %s2432_s21, %s1516_s30  }
 0x544 PF: > { %p1673_p5 = scmp.ge.s32.totalorder %s1885_s12, 2  ;;  %s1543_s17 = sand.u32 1, %s1857_s27  }
 0x545   : > { %s1544_s13 = scalar_lea.sflag [#allocation3], %s1543_s17 }
 0x546   : > { %p1670_p6 = pnand %p1673_p5, %p2008_p8 }
 0x548   : > { %1852 = dma.done.wait (!%p1670_p6), %s1544_s13, 128  }
 0x549   : > { %1854 = vsyncadd (!%p1670_p6), %s1544_s13, 4294967168  ;;  %s21_s12 = sadd.s32 1, %s1885_s12   ;;  %s2520_s18 = sld [smem:[#allocation9_spill]] }
 0x54a   : > { %p18_p7 = scmp.ge.s32.totalorder %s21_s12, 6   ;;  %s2521_s30 = sld [smem:[#allocation5_spill]] }
 0x54b   : > { %s2522_s9 = sld [smem:[#allocation6_spill]]  ;;  %s2523_s10 = sld [smem:[#allocation7_spill]] }
 0x54c   : > { %s2524_s11 = sld [smem:[#allocation8_spill]]  ;;  %s2525_s27 = smov %s1861_s28 }
 0x54d   : > { %s2526_s28 = smov %s1865_s29  ;;  %20 = sbr.rel (!%p18_p7) target bundleno = 5 (0x5), region = 87 }
 0x54f   : > { %s2527_s29 = smov %s2520_s18 }
 0x554   :  { %1549 = vsyncpa [#allocation3], 1 }
 0x555   :  { %1551 = vsyncpa [#allocation3 + $0x1], 1 }

</bundles_post_ra>
